<compile_context>
chip_gen: v5e
topology: v5e:2x2
jax: 0.10.0
libtpu: 0.0.40
codegen_flags: <defaults>
</compile_context>

<pallas_src>
import functools
from typing import NamedTuple, Optional

import jax
import jax.numpy as jnp
from jax.experimental import pallas as pl
from jax.experimental.pallas import tpu as pltpu


def _round_up(a, b):
    return (a + b - 1) // b * b


# ---------------- pure-JAX reference (mirrors the PyTorch forward) ----------------

def _rmsnorm(x, gamma, eps=1e-8):
    var = jnp.mean(x * x, axis=-1, keepdims=True)
    return x * jax.lax.rsqrt(var + eps) * gamma


def _activation_quant(x):
    scale = 127.0 / jnp.clip(jnp.max(jnp.abs(x), axis=-1, keepdims=True), 1e-5, None)
    return jnp.clip(jnp.round(x * scale), -128.0, 127.0) / scale


def _weight_quant(w):
    scale = 1.0 / jnp.clip(jnp.mean(jnp.abs(w)), 1e-5, None)
    return jnp.clip(jnp.round(w * scale), -1.0, 1.0) / scale


def hgrn_bit_mlp_ref(x, w_gate, w_down, g1, g2):
    xn = _activation_quant(_rmsnorm(x, g1))
    y = xn @ _weight_quant(w_gate).T
    I = w_gate.shape[0] // 2
    gate, up = y[..., :I], y[..., I:]
    h = gate * jax.nn.sigmoid(gate) * up
    hn = _activation_quant(_rmsnorm(h, g2))
    return hn @ _weight_quant(w_down).T


# ---------------------------- Pallas kernel ----------------------------

def hgrn_bit_mlp_kernel(x_ref, wg_ref, wu_ref, wd_ref, g1_ref, g2_ref,
                        o_ref, h_ref, *,
                        hidden_size, intermediate_size, chunk_i, n_chunks):
    f32 = jnp.float32
    cdt = wg_ref.dtype                               # MXU compute dtype (bf16)

    x = x_ref[...].astype(f32)                       # [tt, Hp]
    g1 = g1_ref[...].astype(f32)                     # [1, Hp]  (gate/up wdeq folded in)
    g2 = g2_ref[...].astype(f32)                     # [1, Ip]  (down  wdeq folded in)

    # ---- BitLinear #1 activation path: RMSNorm -> absmax int8 fake quant (factored) ----
    # mean over the TRUE hidden size (padded lanes are zero).
    ss = jnp.sum(x * x, axis=-1, keepdims=True) * (1.0 / hidden_size)
    xn = x * jax.lax.rsqrt(ss + 1e-8) * g1
    amax = jnp.clip(jnp.max(jnp.abs(xn), axis=-1, keepdims=True), 1e-5, None)
    xq = jnp.clip(jnp.round(xn * (127.0 / amax)), -128.0, 127.0)   # integers
    xqb = xq.astype(cdt)                              # exact in bf16 (|q| <= 128)
    xdeq = amax * (1.0 / 127.0)                       # [tt, 1] (weight scale already in g1)

    # ---- gate/up projection + swiglu, chunked over I to bound live f32 temporaries ----
    ss2 = jnp.zeros_like(amax)                        # running sum(h^2) per token
    hg_max = jnp.zeros_like(amax)                     # running max|h * g2| per token
    for c in range(n_chunks):
        lo, hi = c * chunk_i, (c + 1) * chunk_i
        gate = jnp.dot(xqb, wg_ref[:, lo:hi], preferred_element_type=f32) * xdeq
        up = jnp.dot(xqb, wu_ref[:, lo:hi], preferred_element_type=f32) * xdeq
        hc = gate * jax.nn.sigmoid(gate) * up         # [tt, chunk] f32
        h_ref[:, lo:hi] = hc
        ss2 = ss2 + jnp.sum(hc * hc, axis=-1, keepdims=True)
        hg_max = jnp.maximum(
            hg_max, jnp.max(jnp.abs(hc * g2[:, lo:hi]), axis=-1, keepdims=True))

    # ---- BitLinear #2 activation stats (RMSNorm + absmax over the full, true I) ----
    rs2 = jax.lax.rsqrt(ss2 * (1.0 / intermediate_size) + 1e-8)    # [tt, 1]
    amax2 = jnp.clip(hg_max * rs2, 1e-5, None)
    qs2 = 127.0 / amax2

    # ---- down projection: quantize each K chunk on the fly, accumulate in f32 ----
    acc = jnp.zeros((x.shape[0], o_ref.shape[-1]), f32)
    for c in range(n_chunks):
        lo, hi = c * chunk_i, (c + 1) * chunk_i
        hn = h_ref[:, lo:hi] * rs2 * g2[:, lo:hi]
        hq = jnp.clip(jnp.round(hn * qs2), -128.0, 127.0).astype(cdt)
        acc = acc + jnp.dot(hq, wd_ref[lo:hi, :], preferred_element_type=f32)

    o_ref[...] = (acc * (amax2 * (1.0 / 127.0))).astype(o_ref.dtype)


# ---------------------------- weight prep (one-time) ----------------------------

class HGRNBitMLPParams(NamedTuple):
    w_gate_t: jax.Array      # [H_pad, I_pad] ternary {-1,0,1}, compute dtype (bf16)
    w_up_t: jax.Array        # [H_pad, I_pad]
    w_down_t: jax.Array      # [I_pad, H_pad]
    gamma1: jax.Array        # [1, H_pad] f32, includes gate/up weight-dequant scale
    gamma2: jax.Array        # [1, I_pad] f32, includes down weight-dequant scale
    hidden_size: int
    intermediate_size: int


def prepare_hgrn_bit_mlp_params(w_gate, w_down, g1, g2, *, compute_dtype=jnp.bfloat16):
    """One-time prep: ternary-quantize (scale over the FULL weight), transpose, split
    gate/up halves, pad feature dims to multiples of 128, narrow to bf16, and fold the
    global weight-dequant scales into the RMSNorm gammas."""
    two_I, H = w_gate.shape
    I = two_I // 2
    assert w_down.shape == (H, I)
    H_pad = _round_up(H, 128)
    I_pad = _round_up(I, 128)

    def ternary(w):
        w = w.astype(jnp.float32)
        deq = jnp.clip(jnp.mean(jnp.abs(w)), 1e-5, None)          # = 1 / scale
        tern = jnp.clip(jnp.round(w * (1.0 / deq)), -1.0, 1.0)     # {-1, 0, 1}
        return tern, deq

    wg_tern, wg_deq = ternary(w_gate)     # scale computed over full [2I, H]
    wd_tern, wd_deq = ternary(w_down)

    wg_t = wg_tern.T                      # [H, 2I]

    def pad2(a, rows, cols):
        return jnp.pad(a, ((0, rows - a.shape[0]), (0, cols - a.shape[1])))

    w_gate_t = pad2(wg_t[:, :I], H_pad, I_pad).astype(compute_dtype)
    w_up_t = pad2(wg_t[:, I:], H_pad, I_pad).astype(compute_dtype)
    w_down_t = pad2(wd_tern.T, I_pad, H_pad).astype(compute_dtype)

    # Fold weight-dequant scales into the gammas: scaling gamma scales the per-token
    # absmax identically, so the quantized integers and final result are unchanged
    # (only the 1e-5 amax clamp could theoretically differ, far from these magnitudes).
    gamma1 = jnp.pad(g1.astype(jnp.float32) * wg_deq, (0, H_pad - H)).reshape(1, H_pad)
    gamma2 = jnp.pad(g2.astype(jnp.float32) * wd_deq, (0, I_pad - I)).reshape(1, I_pad)

    return HGRNBitMLPParams(w_gate_t, w_up_t, w_down_t, gamma1, gamma2, H, I)


# ---------------------------- wrapper ----------------------------

def _default_tile_t():
    # v5e: 4x128 MXU, 16 MiB default scoped VMEM, 1 vector-store slot -> 128 rows.
    # v6e / v7x: 256-wide MXU and more headroom -> 256 rows.
    try:
        kind = jax.devices()[0].device_kind.lower()
    except Exception:
        return 256
    return 128 if ("v5 lite" in kind or "v5e" in kind or "v5lite" in kind) else 256


def _vmem_capacity_bytes():
    try:
        return int(pltpu.get_tpu_info().vmem_capacity_bytes)
    except Exception:
        return 64 * 1024 * 1024   # v7x per-TC VMEM: safe lower bound across generations


def hgrn_bit_mlp(x, params: HGRNBitMLPParams, *, tile_t: Optional[int] = None,
                 max_chunk_i: int = 512):
    """x: [B, S, H].  tile_t defaults per TPU generation; max_chunk_i bounds the live
    f32 intermediate width inside the kernel."""
    B, S, H = x.shape
    assert H == params.hidden_size
    I = params.intermediate_size
    H_pad, I_pad = params.w_gate_t.shape
    T = B * S
    out_dtype = x.dtype

    # ---- token tile ----
    if tile_t is None:
        tile_t = _default_tile_t()
    tile_t = max(16, _round_up(min(tile_t, _round_up(T, 16)), 16))   # 16: bf16 min sublanes
    # v7x has 2 TensorCores sharding the "parallel" token axis: keep >= 2 grid steps
    # whenever there are enough tokens (harmless on single-TC v5e/v6e).
    if T >= 32 and pl.cdiv(T, tile_t) < 2:
        tile_t = _round_up(pl.cdiv(T, 2), 16)
    n_steps = pl.cdiv(T, tile_t)

    # ---- intermediate-dim chunking ----
    max_chunk_i = max(128, _round_up(max_chunk_i, 128))
    chunk_i = min(I_pad, max_chunk_i)
    while I_pad % chunk_i:          # both are multiples of 128, so this terminates
        chunk_i -= 128
    n_chunks = I_pad // chunk_i

    # ---- activations: pad feature lanes only; token axis uses ragged edge blocks ----
    x2d = x.reshape(T, H)
    if H_pad != H:
        x2d = jnp.pad(x2d, ((0, 0), (0, H_pad - H)))   # zero lanes keep reductions exact

    kernel = functools.partial(
        hgrn_bit_mlp_kernel,
        hidden_size=H, intermediate_size=I, chunk_i=chunk_i, n_chunks=n_chunks)

    w_sz = params.w_gate_t.dtype.itemsize
    in_sz = x2d.dtype.itemsize
    out_sz = jnp.dtype(out_dtype).itemsize
    weight_bytes = w_sz * (2 * H_pad * I_pad + I_pad * H_pad)

    def _vmem_limit(weight_buffers):
        need = (weight_buffers * weight_bytes                 # resident ternary weights
                + weight_buffers * 4 * (H_pad + I_pad)        # gammas
                + 2 * tile_t * H_pad * (in_sz + out_sz)       # double-buffered x / out tiles
                + 4 * tile_t * I_pad                          # h scratch
                + 4 * tile_t * (4 * chunk_i + 3 * H_pad))     # live chunk temporaries / acc
        need = int(need * 1.25) + (2 << 20)
        return int(min(_vmem_capacity_bytes(), max(need, 32 << 20)))

    def build(single_buffer_weights):
        wmode = ({"pipeline_mode": pl.Buffered(1)} if single_buffer_weights else {})
        in_specs = [
            pl.BlockSpec((tile_t, H_pad), lambda i: (i, 0)),             # x tile
            pl.BlockSpec((H_pad, I_pad), lambda i: (0, 0), **wmode),     # ternary gate half
            pl.BlockSpec((H_pad, I_pad), lambda i: (0, 0), **wmode),     # ternary up half
            pl.BlockSpec((I_pad, H_pad), lambda i: (0, 0), **wmode),     # ternary down
            pl.BlockSpec((1, H_pad), lambda i: (0, 0), **wmode),         # gamma1 (* wdeq)
            pl.BlockSpec((1, I_pad), lambda i: (0, 0), **wmode),         # gamma2 (* wdeq)
        ]
        return pl.pallas_call(
            kernel,
            out_shape=jax.ShapeDtypeStruct((T, H_pad), out_dtype),
            grid_spec=pltpu.PrefetchScalarGridSpec(
                num_scalar_prefetch=0,
                grid=(n_steps,),
                in_specs=in_specs,
                out_specs=pl.BlockSpec((tile_t, H_pad), lambda i: (i, 0)),
                scratch_shapes=[pltpu.VMEM((tile_t, I_pad), jnp.float32)],
            ),
            compiler_params=pltpu.CompilerParams(
                dimension_semantics=("parallel",),
                vmem_limit_bytes=_vmem_limit(1 if single_buffer_weights else 2)),
        )

    args = (x2d, params.w_gate_t, params.w_up_t, params.w_down_t,
            params.gamma1, params.gamma2)
    try:
        # Grid-invariant weights/gammas single-buffered (constant index_map -> no re-DMA).
        out = build(True)(*args)
        out = jax.block_until_ready(out)
    except Exception:
        # Fallback for jax versions without BlockSpec(pipeline_mode=...).
        out = build(False)(*args)

    if H_pad != H:
        out = out[:, :H]
    return out.reshape(B, S, H)


if __name__ == "__main__":
    # Module config (matches HGRNBitMLP defaults):
    hidden_size = 32
    hidden_ratio = 4
    intermediate_size = int(hidden_size * hidden_ratio * 2 / 3)
    intermediate_size = 256 * ((intermediate_size + 256 - 1) // 256)   # -> 256

    batch, seq = 2, 8

    key = jax.random.PRNGKey(0)
    kx, kg, kd = jax.random.split(key, 3)
    x = jax.random.normal(kx, (batch, seq, hidden_size), dtype=jnp.float32)
    # BitLinear is an nn.Linear: weight layout [out_features, in_features].
    w_gate = 0.02 * jax.random.normal(
        kg, (2 * intermediate_size, hidden_size), dtype=jnp.float32)
    w_down = 0.02 * jax.random.normal(
        kd, (hidden_size, intermediate_size), dtype=jnp.float32)
    # RMSNorm weights inside each BitLinear init to ones.
    g1 = jnp.ones((hidden_size,), dtype=jnp.float32)
    g2 = jnp.ones((intermediate_size,), dtype=jnp.float32)

    # One-time weight prep (quantize / transpose / split / pad / narrow / fold scales).
    params = prepare_hgrn_bit_mlp_params(w_gate, w_down, g1, g2)
    jax.block_until_ready(params.w_gate_t)

    z = hgrn_bit_mlp(x, params)
    jax.block_until_ready(z)

    z_ref = hgrn_bit_mlp_ref(x, w_gate, w_down, g1, g2)
    assert z.shape == (batch, seq, hidden_size)
    assert jnp.allclose(z, z_ref, atol=1e-3, rtol=1e-3), "mismatch vs reference"

    print("KERNEL_OK")
</pallas_src>

<mosaic_0001>
module attributes {stable_mosaic.version = 11 : i64} {
  func.func @hgrn_bit_mlp_kernel(%arg0: i32, %arg1: memref<16x128xf32, #tpu.memory_space<vmem>>, %arg2: memref<128x256xbf16, #tpu.memory_space<vmem>>, %arg3: memref<128x256xbf16, #tpu.memory_space<vmem>>, %arg4: memref<256x128xbf16, #tpu.memory_space<vmem>>, %arg5: memref<1x128xf32, #tpu.memory_space<vmem>>, %arg6: memref<1x256xf32, #tpu.memory_space<vmem>>, %arg7: memref<16x128xf32, #tpu.memory_space<vmem>>, %arg8: memref<16x256xf32, #tpu.memory_space<vmem>>) attributes {dimension_semantics = [#tpu.dimension_semantics<parallel>], iteration_bounds = array<i64: 1>, scalar_prefetch = 0 : i64, scratch_operands = 1 : i64, tpu.core_type = #tpu.core_type<tc>, window_params = [{transform_indices = @transform_0, window_bounds = array<i64: 16, 128>}, {pipeline_mode = #tpu.pipeline_mode<synchronous>, transform_indices = @transform_1, window_bounds = array<i64: 128, 256>}, {pipeline_mode = #tpu.pipeline_mode<synchronous>, transform_indices = @transform_2, window_bounds = array<i64: 128, 256>}, {pipeline_mode = #tpu.pipeline_mode<synchronous>, transform_indices = @transform_3, window_bounds = array<i64: 256, 128>}, {pipeline_mode = #tpu.pipeline_mode<synchronous>, transform_indices = @transform_4, window_bounds = array<i64: 1, 128>}, {pipeline_mode = #tpu.pipeline_mode<synchronous>, transform_indices = @transform_5, window_bounds = array<i64: 1, 256>}, {transform_indices = @transform_6, window_bounds = array<i64: 16, 128>}]} {
    %c0 = arith.constant 0 : index
    %c0_0 = arith.constant 0 : index
    %0 = vector.load %arg1[%c0, %c0_0] : memref<16x128xf32, #tpu.memory_space<vmem>>, vector<16x128xf32>
    %c0_1 = arith.constant 0 : index
    %c0_2 = arith.constant 0 : index
    %1 = vector.load %arg5[%c0_1, %c0_2] : memref<1x128xf32, #tpu.memory_space<vmem>>, vector<1x128xf32>
    %c0_3 = arith.constant 0 : index
    %c0_4 = arith.constant 0 : index
    %2 = vector.load %arg6[%c0_3, %c0_4] : memref<1x256xf32, #tpu.memory_space<vmem>>, vector<1x256xf32>
    %3 = arith.mulf %0, %0 : vector<16x128xf32>
    %cst = arith.constant dense<0.000000e+00> : vector<16xf32>
    %4 = vector.multi_reduction <add>, %3, %cst [1] : vector<16x128xf32> to vector<16xf32>
    %5 = vector.shape_cast %4 : vector<16xf32> to vector<16x1xf32>
    %cst_5 = arith.constant 3.125000e-02 : f32
    %6 = vector.broadcast %cst_5 : f32 to vector<16x1xf32>
    %7 = arith.mulf %5, %6 : vector<16x1xf32>
    %cst_6 = arith.constant 9.99999993E-9 : f32
    %8 = vector.broadcast %cst_6 : f32 to vector<16x1xf32>
    %9 = arith.addf %7, %8 : vector<16x1xf32>
    %10 = math.rsqrt %9 : vector<16x1xf32>
    %11 = vector.broadcast %10 : vector<16x1xf32> to vector<16x128xf32>
    %12 = arith.mulf %0, %11 : vector<16x128xf32>
    %13 = vector.broadcast %1 : vector<1x128xf32> to vector<16x128xf32>
    %14 = arith.mulf %12, %13 : vector<16x128xf32>
    %15 = math.absf %14 : vector<16x128xf32>
    %cst_7 = arith.constant dense<0xFF800000> : vector<16xf32>
    %16 = vector.multi_reduction <maximumf>, %15, %cst_7 [1] : vector<16x128xf32> to vector<16xf32>
    %17 = vector.shape_cast %16 : vector<16xf32> to vector<16x1xf32>
    %cst_8 = arith.constant 9.99999974E-6 : f32
    %18 = vector.broadcast %cst_8 : f32 to vector<16x1xf32>
    %19 = arith.maximumf %18, %17 : vector<16x1xf32>
    %cst_9 = arith.constant 1.270000e+02 : f32
    %20 = vector.broadcast %cst_9 : f32 to vector<16x1xf32>
    %21 = arith.divf %20, %19 : vector<16x1xf32>
    %22 = vector.broadcast %21 : vector<16x1xf32> to vector<16x128xf32>
    %23 = arith.mulf %14, %22 : vector<16x128xf32>
    %24 = math.roundeven %23 : vector<16x128xf32>
    %cst_10 = arith.constant -1.280000e+02 : f32
    %cst_11 = arith.constant 1.270000e+02 : f32
    %25 = vector.broadcast %cst_10 : f32 to vector<16x128xf32>
    %26 = arith.maximumf %25, %24 : vector<16x128xf32>
    %27 = vector.broadcast %cst_11 : f32 to vector<16x128xf32>
    %28 = arith.minimumf %27, %26 : vector<16x128xf32>
    %29 = arith.truncf %28 : vector<16x128xf32> to vector<16x128xbf16>
    %cst_12 = arith.constant 0.00787401571 : f32
    %30 = vector.broadcast %cst_12 : f32 to vector<16x1xf32>
    %31 = arith.mulf %19, %30 : vector<16x1xf32>
    %cst_13 = arith.constant 0.000000e+00 : f32
    %32 = vector.broadcast %cst_13 : f32 to vector<16x1xf32>
    %cst_14 = arith.constant 0.000000e+00 : f32
    %33 = vector.broadcast %cst_14 : f32 to vector<16x1xf32>
    %c0_15 = arith.constant 0 : index
    %c0_16 = arith.constant 0 : index
    %34 = vector.load %arg2[%c0_15, %c0_16] : memref<128x256xbf16, #tpu.memory_space<vmem>>, vector<128x256xbf16>
    %cst_17 = arith.constant dense<0.000000e+00> : vector<16x256xf32>
    %35 = tpu.matmul %29, %34, %cst_17 {dimension_numbers = #tpu.dot_dimension_numbers<[1], [0], [0], [1], [0, 0, 1, 1], [], []>} : vector<16x128xbf16>, vector<128x256xbf16>, vector<16x256xf32> -> vector<16x256xf32>
    %36 = vector.broadcast %31 : vector<16x1xf32> to vector<16x256xf32>
    %37 = arith.mulf %35, %36 : vector<16x256xf32>
    %c0_18 = arith.constant 0 : index
    %c0_19 = arith.constant 0 : index
    %38 = vector.load %arg3[%c0_18, %c0_19] : memref<128x256xbf16, #tpu.memory_space<vmem>>, vector<128x256xbf16>
    %cst_20 = arith.constant dense<0.000000e+00> : vector<16x256xf32>
    %39 = tpu.matmul %29, %38, %cst_20 {dimension_numbers = #tpu.dot_dimension_numbers<[1], [0], [0], [1], [0, 0, 1, 1], [], []>} : vector<16x128xbf16>, vector<128x256xbf16>, vector<16x256xf32> -> vector<16x256xf32>
    %40 = vector.broadcast %31 : vector<16x1xf32> to vector<16x256xf32>
    %41 = arith.mulf %39, %40 : vector<16x256xf32>
    %42 = arith.negf %37 : vector<16x256xf32>
    %43 = math.exp %42 : vector<16x256xf32>
    %cst_21 = arith.constant 1.000000e+00 : f32
    %44 = vector.broadcast %cst_21 : f32 to vector<16x256xf32>
    %45 = arith.addf %44, %43 : vector<16x256xf32>
    %46 = arith.divf %44, %45 : vector<16x256xf32>
    %47 = arith.mulf %37, %46 : vector<16x256xf32>
    %48 = arith.mulf %47, %41 : vector<16x256xf32>
    %c0_22 = arith.constant 0 : index
    %c0_23 = arith.constant 0 : index
    %49 = vector.load %arg8[%c0_22, %c0_23] : memref<16x256xf32, #tpu.memory_space<vmem>>, vector<16x256xf32>
    tpu.vector_store %arg8[%c0_22, %c0_23], %48 {strides = array<i32>} : memref<16x256xf32, #tpu.memory_space<vmem>>, vector<16x256xf32>,
    %50 = arith.mulf %48, %48 : vector<16x256xf32>
    %cst_24 = arith.constant dense<0.000000e+00> : vector<16xf32>
    %51 = vector.multi_reduction <add>, %50, %cst_24 [1] : vector<16x256xf32> to vector<16xf32>
    %52 = vector.shape_cast %51 : vector<16xf32> to vector<16x1xf32>
    %53 = arith.addf %32, %52 : vector<16x1xf32>
    %54 = vector.broadcast %2 : vector<1x256xf32> to vector<16x256xf32>
    %55 = arith.mulf %48, %54 : vector<16x256xf32>
    %56 = math.absf %55 : vector<16x256xf32>
    %cst_25 = arith.constant dense<0xFF800000> : vector<16xf32>
    %57 = vector.multi_reduction <maximumf>, %56, %cst_25 [1] : vector<16x256xf32> to vector<16xf32>
    %58 = vector.shape_cast %57 : vector<16xf32> to vector<16x1xf32>
    %59 = arith.maximumf %33, %58 : vector<16x1xf32>
    %cst_26 = arith.constant 3.906250e-03 : f32
    %60 = vector.broadcast %cst_26 : f32 to vector<16x1xf32>
    %61 = arith.mulf %53, %60 : vector<16x1xf32>
    %cst_27 = arith.constant 9.99999993E-9 : f32
    %62 = vector.broadcast %cst_27 : f32 to vector<16x1xf32>
    %63 = arith.addf %61, %62 : vector<16x1xf32>
    %64 = math.rsqrt %63 : vector<16x1xf32>
    %65 = arith.mulf %59, %64 : vector<16x1xf32>
    %cst_28 = arith.constant 9.99999974E-6 : f32
    %66 = vector.broadcast %cst_28 : f32 to vector<16x1xf32>
    %67 = arith.maximumf %66, %65 : vector<16x1xf32>
    %cst_29 = arith.constant 1.270000e+02 : f32
    %68 = vector.broadcast %cst_29 : f32 to vector<16x1xf32>
    %69 = arith.divf %68, %67 : vector<16x1xf32>
    %cst_30 = arith.constant 0.000000e+00 : f32
    %70 = vector.broadcast %cst_30 : f32 to vector<16x128xf32>
    %c0_31 = arith.constant 0 : index
    %c0_32 = arith.constant 0 : index
    %71 = vector.load %arg8[%c0_31, %c0_32] : memref<16x256xf32, #tpu.memory_space<vmem>>, vector<16x256xf32>
    %72 = vector.broadcast %64 : vector<16x1xf32> to vector<16x256xf32>
    %73 = arith.mulf %71, %72 : vector<16x256xf32>
    %74 = vector.broadcast %2 : vector<1x256xf32> to vector<16x256xf32>
    %75 = arith.mulf %73, %74 : vector<16x256xf32>
    %76 = vector.broadcast %69 : vector<16x1xf32> to vector<16x256xf32>
    %77 = arith.mulf %75, %76 : vector<16x256xf32>
    %78 = math.roundeven %77 : vector<16x256xf32>
    %cst_33 = arith.constant -1.280000e+02 : f32
    %cst_34 = arith.constant 1.270000e+02 : f32
    %79 = vector.broadcast %cst_33 : f32 to vector<16x256xf32>
    %80 = arith.maximumf %79, %78 : vector<16x256xf32>
    %81 = vector.broadcast %cst_34 : f32 to vector<16x256xf32>
    %82 = arith.minimumf %81, %80 : vector<16x256xf32>
    %83 = arith.truncf %82 : vector<16x256xf32> to vector<16x256xbf16>
    %c0_35 = arith.constant 0 : index
    %c0_36 = arith.constant 0 : index
    %84 = vector.load %arg4[%c0_35, %c0_36] : memref<256x128xbf16, #tpu.memory_space<vmem>>, vector<256x128xbf16>
    %cst_37 = arith.constant dense<0.000000e+00> : vector<16x128xf32>
    %85 = tpu.matmul %83, %84, %cst_37 {dimension_numbers = #tpu.dot_dimension_numbers<[1], [0], [0], [1], [0, 0, 1, 1], [], []>} : vector<16x256xbf16>, vector<256x128xbf16>, vector<16x128xf32> -> vector<16x128xf32>
    %86 = arith.addf %70, %85 : vector<16x128xf32>
    %cst_38 = arith.constant 0.00787401571 : f32
    %87 = vector.broadcast %cst_38 : f32 to vector<16x1xf32>
    %88 = arith.mulf %67, %87 : vector<16x1xf32>
    %89 = vector.broadcast %88 : vector<16x1xf32> to vector<16x128xf32>
    %90 = arith.mulf %86, %89 : vector<16x128xf32>
    %c0_39 = arith.constant 0 : index
    %c0_40 = arith.constant 0 : index
    %91 = vector.load %arg7[%c0_39, %c0_40] : memref<16x128xf32, #tpu.memory_space<vmem>>, vector<16x128xf32>
    tpu.vector_store %arg7[%c0_39, %c0_40], %90 {strides = array<i32>} : memref<16x128xf32, #tpu.memory_space<vmem>>, vector<16x128xf32>,
    return
  }
  func.func @transform_0(%arg0: i32) -> (i32, i32) {
    %c0_i32 = arith.constant 0 : i32
    %c0_i32_0 = arith.constant 0 : i32
    return %arg0, %c0_i32 : i32, i32
  }
  func.func @transform_1(%arg0: i32) -> (i32, i32) {
    %c0_i32 = arith.constant 0 : i32
    %c0_i32_0 = arith.constant 0 : i32
    %c0_i32_1 = arith.constant 0 : i32
    return %c0_i32, %c0_i32_0 : i32, i32
  }
  func.func @transform_2(%arg0: i32) -> (i32, i32) {
    %c0_i32 = arith.constant 0 : i32
    %c0_i32_0 = arith.constant 0 : i32
    %c0_i32_1 = arith.constant 0 : i32
    return %c0_i32, %c0_i32_0 : i32, i32
  }
  func.func @transform_3(%arg0: i32) -> (i32, i32) {
    %c0_i32 = arith.constant 0 : i32
    %c0_i32_0 = arith.constant 0 : i32
    %c0_i32_1 = arith.constant 0 : i32
    return %c0_i32, %c0_i32_0 : i32, i32
  }
  func.func @transform_4(%arg0: i32) -> (i32, i32) {
    %c0_i32 = arith.constant 0 : i32
    %c0_i32_0 = arith.constant 0 : i32
    %c0_i32_1 = arith.constant 0 : i32
    return %c0_i32, %c0_i32_0 : i32, i32
  }
  func.func @transform_5(%arg0: i32) -> (i32, i32) {
    %c0_i32 = arith.constant 0 : i32
    %c0_i32_0 = arith.constant 0 : i32
    %c0_i32_1 = arith.constant 0 : i32
    return %c0_i32, %c0_i32_0 : i32, i32
  }
  func.func @transform_6(%arg0: i32) -> (i32, i32) {
    %c0_i32 = arith.constant 0 : i32
    %c0_i32_0 = arith.constant 0 : i32
    return %arg0, %c0_i32 : i32, i32
  }
}

module attributes {stable_mosaic.version = 11 : i64} {
  func.func @hgrn_bit_mlp_kernel(%arg0: i32, %arg1: memref<16x128xf32, #tpu.memory_space<vmem>>, %arg2: memref<128x256xbf16, #tpu.memory_space<vmem>>, %arg3: memref<128x256xbf16, #tpu.memory_space<vmem>>, %arg4: memref<256x128xbf16, #tpu.memory_space<vmem>>, %arg5: memref<1x128xf32, #tpu.memory_space<vmem>>, %arg6: memref<1x256xf32, #tpu.memory_space<vmem>>, %arg7: memref<16x128xf32, #tpu.memory_space<vmem>>, %arg8: memref<16x256xf32, #tpu.memory_space<vmem>>) attributes {dimension_semantics = [#tpu.dimension_semantics<parallel>], iteration_bounds = array<i64: 1>, scalar_prefetch = 0 : i64, scratch_operands = 1 : i64, tpu.core_type = #tpu.core_type<tc>, window_params = [{transform_indices = @transform_0, window_bounds = array<i64: 16, 128>}, {pipeline_mode = #tpu.pipeline_mode<synchronous>, transform_indices = @transform_1, window_bounds = array<i64: 128, 256>}, {pipeline_mode = #tpu.pipeline_mode<synchronous>, transform_indices = @transform_2, window_bounds = array<i64: 128, 256>}, {pipeline_mode = #tpu.pipeline_mode<synchronous>, transform_indices = @transform_3, window_bounds = array<i64: 256, 128>}, {pipeline_mode = #tpu.pipeline_mode<synchronous>, transform_indices = @transform_4, window_bounds = array<i64: 1, 128>}, {pipeline_mode = #tpu.pipeline_mode<synchronous>, transform_indices = @transform_5, window_bounds = array<i64: 1, 256>}, {transform_indices = @transform_6, window_bounds = array<i64: 16, 128>}]} {
    %c0 = arith.constant 0 : index
    %c0_0 = arith.constant 0 : index
    %0 = vector.load %arg1[%c0, %c0_0] : memref<16x128xf32, #tpu.memory_space<vmem>>, vector<16x128xf32>
    %c0_1 = arith.constant 0 : index
    %c0_2 = arith.constant 0 : index
    %1 = vector.load %arg5[%c0_1, %c0_2] : memref<1x128xf32, #tpu.memory_space<vmem>>, vector<1x128xf32>
    %c0_3 = arith.constant 0 : index
    %c0_4 = arith.constant 0 : index
    %2 = vector.load %arg6[%c0_3, %c0_4] : memref<1x256xf32, #tpu.memory_space<vmem>>, vector<1x256xf32>
    %3 = arith.mulf %0, %0 : vector<16x128xf32>
    %cst = arith.constant dense<0.000000e+00> : vector<16xf32>
    %4 = vector.multi_reduction <add>, %3, %cst [1] : vector<16x128xf32> to vector<16xf32>
    %5 = vector.shape_cast %4 : vector<16xf32> to vector<16x1xf32>
    %cst_5 = arith.constant 3.125000e-02 : f32
    %6 = vector.broadcast %cst_5 : f32 to vector<16x1xf32>
    %7 = arith.mulf %5, %6 : vector<16x1xf32>
    %cst_6 = arith.constant 9.99999993E-9 : f32
    %8 = vector.broadcast %cst_6 : f32 to vector<16x1xf32>
    %9 = arith.addf %7, %8 : vector<16x1xf32>
    %10 = math.rsqrt %9 : vector<16x1xf32>
    %11 = vector.broadcast %10 : vector<16x1xf32> to vector<16x128xf32>
    %12 = arith.mulf %0, %11 : vector<16x128xf32>
    %13 = vector.broadcast %1 : vector<1x128xf32> to vector<16x128xf32>
    %14 = arith.mulf %12, %13 : vector<16x128xf32>
    %15 = math.absf %14 : vector<16x128xf32>
    %cst_7 = arith.constant dense<0xFF800000> : vector<16xf32>
    %16 = vector.multi_reduction <maximumf>, %15, %cst_7 [1] : vector<16x128xf32> to vector<16xf32>
    %17 = vector.shape_cast %16 : vector<16xf32> to vector<16x1xf32>
    %cst_8 = arith.constant 9.99999974E-6 : f32
    %18 = vector.broadcast %cst_8 : f32 to vector<16x1xf32>
    %19 = arith.maximumf %18, %17 : vector<16x1xf32>
    %cst_9 = arith.constant 1.270000e+02 : f32
    %20 = vector.broadcast %cst_9 : f32 to vector<16x1xf32>
    %21 = arith.divf %20, %19 : vector<16x1xf32>
    %22 = vector.broadcast %21 : vector<16x1xf32> to vector<16x128xf32>
    %23 = arith.mulf %14, %22 : vector<16x128xf32>
    %24 = math.roundeven %23 : vector<16x128xf32>
    %cst_10 = arith.constant -1.280000e+02 : f32
    %cst_11 = arith.constant 1.270000e+02 : f32
    %25 = vector.broadcast %cst_10 : f32 to vector<16x128xf32>
    %26 = arith.maximumf %25, %24 : vector<16x128xf32>
    %27 = vector.broadcast %cst_11 : f32 to vector<16x128xf32>
    %28 = arith.minimumf %27, %26 : vector<16x128xf32>
    %29 = arith.truncf %28 : vector<16x128xf32> to vector<16x128xbf16>
    %cst_12 = arith.constant 0.00787401571 : f32
    %30 = vector.broadcast %cst_12 : f32 to vector<16x1xf32>
    %31 = arith.mulf %19, %30 : vector<16x1xf32>
    %cst_13 = arith.constant 0.000000e+00 : f32
    %32 = vector.broadcast %cst_13 : f32 to vector<16x1xf32>
    %cst_14 = arith.constant 0.000000e+00 : f32
    %33 = vector.broadcast %cst_14 : f32 to vector<16x1xf32>
    %c0_15 = arith.constant 0 : index
    %c0_16 = arith.constant 0 : index
    %34 = vector.load %arg2[%c0_15, %c0_16] : memref<128x256xbf16, #tpu.memory_space<vmem>>, vector<128x256xbf16>
    %cst_17 = arith.constant dense<0.000000e+00> : vector<16x256xf32>
    %35 = tpu.matmul %29, %34, %cst_17 {dimension_numbers = #tpu.dot_dimension_numbers<[1], [0], [0], [1], [0, 0, 1, 1], [], []>} : vector<16x128xbf16>, vector<128x256xbf16>, vector<16x256xf32> -> vector<16x256xf32>
    %36 = vector.broadcast %31 : vector<16x1xf32> to vector<16x256xf32>
    %37 = arith.mulf %35, %36 : vector<16x256xf32>
    %c0_18 = arith.constant 0 : index
    %c0_19 = arith.constant 0 : index
    %38 = vector.load %arg3[%c0_18, %c0_19] : memref<128x256xbf16, #tpu.memory_space<vmem>>, vector<128x256xbf16>
    %cst_20 = arith.constant dense<0.000000e+00> : vector<16x256xf32>
    %39 = tpu.matmul %29, %38, %cst_20 {dimension_numbers = #tpu.dot_dimension_numbers<[1], [0], [0], [1], [0, 0, 1, 1], [], []>} : vector<16x128xbf16>, vector<128x256xbf16>, vector<16x256xf32> -> vector<16x256xf32>
    %40 = vector.broadcast %31 : vector<16x1xf32> to vector<16x256xf32>
    %41 = arith.mulf %39, %40 : vector<16x256xf32>
    %42 = arith.negf %37 : vector<16x256xf32>
    %43 = math.exp %42 : vector<16x256xf32>
    %cst_21 = arith.constant 1.000000e+00 : f32
    %44 = vector.broadcast %cst_21 : f32 to vector<16x256xf32>
    %45 = arith.addf %44, %43 : vector<16x256xf32>
    %46 = arith.divf %44, %45 : vector<16x256xf32>
    %47 = arith.mulf %37, %46 : vector<16x256xf32>
    %48 = arith.mulf %47, %41 : vector<16x256xf32>
    %c0_22 = arith.constant 0 : index
    %c0_23 = arith.constant 0 : index
    %49 = vector.load %arg8[%c0_22, %c0_23] : memref<16x256xf32, #tpu.memory_space<vmem>>, vector<16x256xf32>
    tpu.vector_store %arg8[%c0_22, %c0_23], %48 {strides = array<i32>} : memref<16x256xf32, #tpu.memory_space<vmem>>, vector<16x256xf32>,
    %50 = arith.mulf %48, %48 : vector<16x256xf32>
    %cst_24 = arith.constant dense<0.000000e+00> : vector<16xf32>
    %51 = vector.multi_reduction <add>, %50, %cst_24 [1] : vector<16x256xf32> to vector<16xf32>
    %52 = vector.shape_cast %51 : vector<16xf32> to vector<16x1xf32>
    %53 = arith.addf %32, %52 : vector<16x1xf32>
    %54 = vector.broadcast %2 : vector<1x256xf32> to vector<16x256xf32>
    %55 = arith.mulf %48, %54 : vector<16x256xf32>
    %56 = math.absf %55 : vector<16x256xf32>
    %cst_25 = arith.constant dense<0xFF800000> : vector<16xf32>
    %57 = vector.multi_reduction <maximumf>, %56, %cst_25 [1] : vector<16x256xf32> to vector<16xf32>
    %58 = vector.shape_cast %57 : vector<16xf32> to vector<16x1xf32>
    %59 = arith.maximumf %33, %58 : vector<16x1xf32>
    %cst_26 = arith.constant 3.906250e-03 : f32
    %60 = vector.broadcast %cst_26 : f32 to vector<16x1xf32>
    %61 = arith.mulf %53, %60 : vector<16x1xf32>
    %cst_27 = arith.constant 9.99999993E-9 : f32
    %62 = vector.broadcast %cst_27 : f32 to vector<16x1xf32>
    %63 = arith.addf %61, %62 : vector<16x1xf32>
    %64 = math.rsqrt %63 : vector<16x1xf32>
    %65 = arith.mulf %59, %64 : vector<16x1xf32>
    %cst_28 = arith.constant 9.99999974E-6 : f32
    %66 = vector.broadcast %cst_28 : f32 to vector<16x1xf32>
    %67 = arith.maximumf %66, %65 : vector<16x1xf32>
    %cst_29 = arith.constant 1.270000e+02 : f32
    %68 = vector.broadcast %cst_29 : f32 to vector<16x1xf32>
    %69 = arith.divf %68, %67 : vector<16x1xf32>
    %cst_30 = arith.constant 0.000000e+00 : f32
    %70 = vector.broadcast %cst_30 : f32 to vector<16x128xf32>
    %c0_31 = arith.constant 0 : index
    %c0_32 = arith.constant 0 : index
    %71 = vector.load %arg8[%c0_31, %c0_32] : memref<16x256xf32, #tpu.memory_space<vmem>>, vector<16x256xf32>
    %72 = vector.broadcast %64 : vector<16x1xf32> to vector<16x256xf32>
    %73 = arith.mulf %71, %72 : vector<16x256xf32>
    %74 = vector.broadcast %2 : vector<1x256xf32> to vector<16x256xf32>
    %75 = arith.mulf %73, %74 : vector<16x256xf32>
    %76 = vector.broadcast %69 : vector<16x1xf32> to vector<16x256xf32>
    %77 = arith.mulf %75, %76 : vector<16x256xf32>
    %78 = math.roundeven %77 : vector<16x256xf32>
    %cst_33 = arith.constant -1.280000e+02 : f32
    %cst_34 = arith.constant 1.270000e+02 : f32
    %79 = vector.broadcast %cst_33 : f32 to vector<16x256xf32>
    %80 = arith.maximumf %79, %78 : vector<16x256xf32>
    %81 = vector.broadcast %cst_34 : f32 to vector<16x256xf32>
    %82 = arith.minimumf %81, %80 : vector<16x256xf32>
    %83 = arith.truncf %82 : vector<16x256xf32> to vector<16x256xbf16>
    %c0_35 = arith.constant 0 : index
    %c0_36 = arith.constant 0 : index
    %84 = vector.load %arg4[%c0_35, %c0_36] : memref<256x128xbf16, #tpu.memory_space<vmem>>, vector<256x128xbf16>
    %cst_37 = arith.constant dense<0.000000e+00> : vector<16x128xf32>
    %85 = tpu.matmul %83, %84, %cst_37 {dimension_numbers = #tpu.dot_dimension_numbers<[1], [0], [0], [1], [0, 0, 1, 1], [], []>} : vector<16x256xbf16>, vector<256x128xbf16>, vector<16x128xf32> -> vector<16x128xf32>
    %86 = arith.addf %70, %85 : vector<16x128xf32>
    %cst_38 = arith.constant 0.00787401571 : f32
    %87 = vector.broadcast %cst_38 : f32 to vector<16x1xf32>
    %88 = arith.mulf %67, %87 : vector<16x1xf32>
    %89 = vector.broadcast %88 : vector<16x1xf32> to vector<16x128xf32>
    %90 = arith.mulf %86, %89 : vector<16x128xf32>
    %c0_39 = arith.constant 0 : index
    %c0_40 = arith.constant 0 : index
    %91 = vector.load %arg7[%c0_39, %c0_40] : memref<16x128xf32, #tpu.memory_space<vmem>>, vector<16x128xf32>
    tpu.vector_store %arg7[%c0_39, %c0_40], %90 {strides = array<i32>} : memref<16x128xf32, #tpu.memory_space<vmem>>, vector<16x128xf32>,
    return
  }
  func.func @transform_0(%arg0: i32) -> (i32, i32) {
    %c0_i32 = arith.constant 0 : i32
    %c0_i32_0 = arith.constant 0 : i32
    return %arg0, %c0_i32 : i32, i32
  }
  func.func @transform_1(%arg0: i32) -> (i32, i32) {
    %c0_i32 = arith.constant 0 : i32
    %c0_i32_0 = arith.constant 0 : i32
    %c0_i32_1 = arith.constant 0 : i32
    return %c0_i32, %c0_i32_0 : i32, i32
  }
  func.func @transform_2(%arg0: i32) -> (i32, i32) {
    %c0_i32 = arith.constant 0 : i32
    %c0_i32_0 = arith.constant 0 : i32
    %c0_i32_1 = arith.constant 0 : i32
    return %c0_i32, %c0_i32_0 : i32, i32
  }
  func.func @transform_3(%arg0: i32) -> (i32, i32) {
    %c0_i32 = arith.constant 0 : i32
    %c0_i32_0 = arith.constant 0 : i32
    %c0_i32_1 = arith.constant 0 : i32
    return %c0_i32, %c0_i32_0 : i32, i32
  }
  func.func @transform_4(%arg0: i32) -> (i32, i32) {
    %c0_i32 = arith.constant 0 : i32
    %c0_i32_0 = arith.constant 0 : i32
    %c0_i32_1 = arith.constant 0 : i32
    return %c0_i32, %c0_i32_0 : i32, i32
  }
  func.func @transform_5(%arg0: i32) -> (i32, i32) {
    %c0_i32 = arith.constant 0 : i32
    %c0_i32_0 = arith.constant 0 : i32
    %c0_i32_1 = arith.constant 0 : i32
    return %c0_i32, %c0_i32_0 : i32, i32
  }
  func.func @transform_6(%arg0: i32) -> (i32, i32) {
    %c0_i32 = arith.constant 0 : i32
    %c0_i32_0 = arith.constant 0 : i32
    return %arg0, %c0_i32 : i32, i32
  }
}

</mosaic_0001>

<bundles_post_ra>
// kernel: tpu_custom_call.1
= control target key start
LH: loop header
LB: loop body
LE: loop exit
PB: predicated region body
PF: predicated region fallthrough
CT: control target
= control target key end

     0   :  { %11 = vsyncpa [#allocation4], 0  ;;  %s1482_s0 = inlined_call_operand.hbm [shape: f32[16,128], index: 0, kind: input, shape index: {}]   ;;  %s1483_s1 = inlined_call_operand.hbm [shape: bf16[128,256], index: 1, kind: input, shape index: {}]   ;;  %s1484_s2 = inlined_call_operand.hbm [shape: bf16[128,256], index: 2, kind: input, shape index: {}]   ;;  %s1485_s3 = inlined_call_operand.hbm [shape: bf16[256,128], index: 3, kind: input, shape index: {}]   ;;  %s1486_s4 = inlined_call_operand.vmem [shape: f32[1,128], index: 4, kind: input, shape index: {}]   ;;  %s1487_s5 = inlined_call_operand.vmem [shape: f32[1,256], index: 5, kind: input, shape index: {}]   ;;  %s1488_s6 = inlined_call_operand.hbm [shape: f32[16,128], index: 6, kind: output, shape index: {}]  }
   0x1   :  { %12 = vsyncpa [#allocation7], 0 }
   0x2   :  { %13 = vsyncpa [#allocation10], 0 }
   0x3   :  { %14 = vsyncpa [#allocation5], 0  ;;  %s32_s23 = sshll.u32 %s1483_s1, 4  ;;  %s1287_s24 = smov [#allocation6]   ;;  %s33_s23 = int_to_ptr.hbm [resolvable:$true] %s32_s23 }
   0x4   :  { %s34_s25 = sshll.u32 %s1287_s24, 4  ;;  %s19_s28 = sshll.u32 %s1482_s0, 4  ;;  %s35_s25 = int_to_ptr.vmem [resolvable:$true] %s34_s25  ;;  %s20_s28 = int_to_ptr.hbm [resolvable:$true] %s19_s28 }
   0x5   :  { %s1288_s29 = smov 128   ;;  %s1289_s30 = smov 8  }
   0x6   :  { %40 = dma.hbm_to_vmem [thread:$0]  %s33_s23, 2048, %s35_s25, [#allocation7], %s1288_s29, %s1288_s29, %s1289_s30  }
   0x7   :  { %s1290_s7 = smov [#allocation3]   ;;  %s45_s1 = sshll.u32 %s1484_s2, 4  ;;  %s46_s1 = int_to_ptr.hbm [resolvable:$true] %s45_s1 }
   0x8   :  { %s21_s8 = sshll.u32 %s1290_s7, 4  ;;  %s58_s12 = sshll.u32 %s1485_s3, 4  ;;  %s22_s8 = int_to_ptr.vmem [resolvable:$true] %s21_s8  ;;  %s59_s12 = int_to_ptr.hbm [resolvable:$true] %s58_s12 }
   0x9   :  { %27 = dma.hbm_to_vmem [thread:$0]  %s20_s28, 256, %s22_s8, [#allocation4], %s1288_s29, %s1288_s29, %s1289_s30  }
   0xa   :  { %s1291_s13 = smov [#allocation8]   ;;  %s1292_s15 = smov [#allocation9]  }
   0xb   :  { %s47_s14 = sshll.u32 %s1291_s13, 4  ;;  %s60_s2 = sshll.u32 %s1292_s15, 4  ;;  %s48_s14 = int_to_ptr.vmem [resolvable:$true] %s47_s14  ;;  %s61_s2 = int_to_ptr.vmem [resolvable:$true] %s60_s2 }
   0xc   :  { %53 = dma.hbm_to_vmem [thread:$0]  %s46_s1, 2048, %s48_s14, [#allocation7], %s1288_s29, %s1288_s29, %s1289_s30  }
   0xd   :  { %s1293_s16 = smov 64   ;;  %s1294_s17 = smov 4  }
   0xe   :  { %66 = dma.hbm_to_vmem [thread:$0]  %s59_s12, 2048, %s61_s2, [#allocation10], %s1293_s16, %s1293_s16, %s1294_s17  }
   0xf   :  { %1279 = dma.done.wait [#allocation4], 256  }
  0x10   :  { %1280 = vsyncadd [#allocation4], 4294967040 }
  0x11   :  { %1281 = dma.done.wait [#allocation7], 4096  }
  0x12   :  { %1282 = vsyncadd [#allocation7], 4294963200 }
  0x13   :  { %1283 = dma.done.wait [#allocation10], 2048  }
  0x14   :  { %1284 = vsyncadd [#allocation10], 4294965248  ;;  %v87_v0 = vld [vmem:[#allocation3] sm:$0xff]  ;;  %v88_v2 = vld [vmem:[#allocation3 + $0x8] sm:$0xff]  ;;  %s810_s23 = sshll.u32 %s1488_s6, 4  ;;  %s811_s23 = int_to_ptr.hbm [resolvable:$true] %s810_s23 }
  0x15   :  { %v91_v1 = vmul.f32 %v87_v0, %v87_v0  ;;  %v92_v3 = vmul.f32 %v88_v2, %v88_v2  ;;  %v1126_v18 = vld [vmem:[%s1486_s4] ss:$0 sm:$0xff]  ;;  %v1036_v32 = vld [vmem:[#allocation6 + $0x74] sm:$0xf0]  ;;  %v1035_v33 = vld [vmem:[#allocation6 + $0x74] sm:$0xf] }
  0x16   :  { %v883_v31 = vld [vmem:[#allocation6 + $0x70] sm:$0xf]  ;;  %v885_v35 = vld [vmem:[#allocation6 + $0x78] sm:$0xf0]  ;;  %v1052_v37 = vld [vmem:[#allocation8 + $0x74] sm:$0xf0] }
  0x17   :  { %93 = vadd.xlane.f32.xlu0 %v91_v1  ;;  %v884_v34 = vor.u32 %v1036_v32, %v883_v31  ;;  %v947_v36 = vld [vmem:[#allocation8 + $0x70] sm:$0xf]  ;;  %v888_v38 = vor.u32 %v1035_v33, %v885_v35  ;;  %v1051_v40 = vld [vmem:[#allocation8 + $0x74] sm:$0xf]  ;;  %v949_v41 = vld [vmem:[#allocation8 + $0x78] sm:$0xf0] }
  0x18   :  { %v948_v39 = vor.u32 %v1052_v37, %v947_v36  ;;  %v952_v42 = vor.u32 %v1051_v40, %v949_v41  ;;  %v875_v43 = vld [vmem:[#allocation6 + $0x60] sm:$0xf]  ;;  %v1034_v44 = vld [vmem:[#allocation6 + $0x64] sm:$0xf0]  ;;  %v1033_v45 = vld [vmem:[#allocation6 + $0x64] sm:$0xf] }
  0x19   :  { %273 = vmatpush.bf16.msra.mxu0 %v884_v34  ;;  %287 = vmatpush.bf16.msra.mxu1 %v888_v38  ;;  %v876_v46 = vor.u32 %v1034_v44, %v875_v43  ;;  %v877_v47 = vld [vmem:[#allocation6 + $0x68] sm:$0xf0]  ;;  %v939_v48 = vld [vmem:[#allocation8 + $0x60] sm:$0xf]  ;;  %v1050_v49 = vld [vmem:[#allocation8 + $0x64] sm:$0xf0] }
  0x1a   :  { %401 = vmatpush.bf16.msra.mxu2 %v948_v39  ;;  %415 = vmatpush.bf16.msra.mxu3 %v952_v42  ;;  %v880_v50 = vor.u32 %v1033_v45, %v877_v47  ;;  %v940_v51 = vor.u32 %v1050_v49, %v939_v48  ;;  %v1049_v52 = vld [vmem:[#allocation8 + $0x64] sm:$0xf]  ;;  %v941_v53 = vld [vmem:[#allocation8 + $0x68] sm:$0xf0]  ;;  %v867_v55 = vld [vmem:[#allocation6 + $0x50] sm:$0xf] }
  0x1b   :  { %v944_v54 = vor.u32 %v1049_v52, %v941_v53  ;;  %v1032_v56 = vld [vmem:[#allocation6 + $0x54] sm:$0xf0]  ;;  %v1031_v57 = vld [vmem:[#allocation6 + $0x54] sm:$0xf]  ;;  %v869_v59 = vld [vmem:[#allocation6 + $0x58] sm:$0xf0] }
  0x1c   :  { %v868_v58 = vor.u32 %v1032_v56, %v867_v55  ;;  %v931_v60 = vld [vmem:[#allocation8 + $0x50] sm:$0xf]  ;;  %v1048_v61 = vld [vmem:[#allocation8 + $0x54] sm:$0xf0]  ;;  %v872_v62 = vor.u32 %v1031_v57, %v869_v59  ;;  %v933_v1 = vld [vmem:[#allocation8 + $0x58] sm:$0xf0] }
  0x1d   :  { %274 = vmatpush.bf16.msra.mxu0 %v876_v46  ;;  %288 = vmatpush.bf16.msra.mxu1 %v880_v50  ;;  %v932_v63 = vor.u32 %v1048_v61, %v931_v60  ;;  %v1025_v31 = vld [vmem:[#allocation6 + $0x24] sm:$0xf]  ;;  %v845_v32 = vld [vmem:[#allocation6 + $0x28] sm:$0xf0]  ;;  %v907_v33 = vld [vmem:[#allocation8 + $0x20] sm:$0xf] }
  0x1e   :  { %402 = vmatpush.bf16.msra.mxu2 %v940_v51  ;;  %416 = vmatpush.bf16.msra.mxu3 %v944_v54  ;;  %v1042_v36 = vld [vmem:[#allocation8 + $0x24] sm:$0xf0]  ;;  %v1041_v37 = vld [vmem:[#allocation8 + $0x24] sm:$0xf]  ;;  %v909_v38 = vld [vmem:[#allocation8 + $0x28] sm:$0xf0]  ;;  %v848_v40 = vor.u32 %v1025_v31, %v845_v32 }
  0x1f   :  { %95 = vadd.xlane.f32.xlu0 %v92_v3  ;;  %v859_v3 = vld [vmem:[#allocation6 + $0x40] sm:$0xf]  ;;  %v908_v41 = vor.u32 %v1042_v36, %v907_v33  ;;  %v835_v42 = vld [vmem:[#allocation6 + $0x10] sm:$0xf]  ;;  %v1024_v43 = vld [vmem:[#allocation6 + $0x14] sm:$0xf0]  ;;  %v912_v44 = vor.u32 %v1041_v37, %v909_v38 }
  0x20   :  { %v1023_v45 = vld [vmem:[#allocation6 + $0x14] sm:$0xf]  ;;  %v837_v46 = vld [vmem:[#allocation6 + $0x18] sm:$0xf0]  ;;  %v899_v47 = vld [vmem:[#allocation8 + $0x10] sm:$0xf]  ;;  %v836_v49 = vor.u32 %v1024_v43, %v835_v42 }
  0x21   :  { %275 = vmatpush.bf16.msra.mxu0 %v868_v58  ;;  %289 = vmatpush.bf16.msra.mxu1 %v872_v62  ;;  %v1040_v48 = vld [vmem:[#allocation8 + $0x14] sm:$0xf0]  ;;  %v1039_v50 = vld [vmem:[#allocation8 + $0x14] sm:$0xf]  ;;  %v901_v51 = vld [vmem:[#allocation8 + $0x18] sm:$0xf0]  ;;  %v840_v52 = vor.u32 %v1023_v45, %v837_v46 }
  0x22   :  { %403 = vmatpush.bf16.msra.mxu2 %v932_v63  ;;  %v900_v53 = vor.u32 %v1040_v48, %v899_v47  ;;  %v827_v54 = vld [vmem:[#allocation6] sm:$0xf]  ;;  %v1022_v55 = vld [vmem:[#allocation6 + $0x4] sm:$0xf0]  ;;  %v1021_v56 = vld [vmem:[#allocation6 + $0x4] sm:$0xf]  ;;  %v904_v57 = vor.u32 %v1039_v50, %v901_v51 }
  0x23   :  { %v829_v58 = vld [vmem:[#allocation6 + $0x8] sm:$0xf0]  ;;  %v891_v59 = vld [vmem:[#allocation8] sm:$0xf]  ;;  %v1038_v60 = vld [vmem:[#allocation8 + $0x4] sm:$0xf0] }
  0x24   :  { %v1037_v61 = vld [vmem:[#allocation8 + $0x4] sm:$0xf]  ;;  %v893_v62 = vld [vmem:[#allocation8 + $0x8] sm:$0xf0] }
  0x8a   :  { %v94_v4 = vpop.xlane.xlu0 %93 }
  0x8b   :  { %v97_v5 = vmul.f32 0.03125, %v94_v4  ;;  %v1030_v4 = vld [vmem:[#allocation6 + $0x44] sm:$0xf0] }
  0x8d   :  { %v99_v6 = vadd.f32 1e-08, %v97_v5  ;;  %v1029_v5 = vld [vmem:[#allocation6 + $0x44] sm:$0xf] }
  0x8f   :  { %1127 = vrsqrt.f32 %v99_v6  ;;  %vm107_vm1 = vweird.f32 %v99_v6 }
  0x92   :  { %v96_v7 = vpop.xlane.xlu0 %95 }
  0x93   :  { %v98_v8 = vmul.f32 0.03125, %v96_v7  ;;  %v861_v7 = vld [vmem:[#allocation6 + $0x48] sm:$0xf0] }
  0x95   :  { %v1128_v9 = vpop.eup %1127  ;;  %v100_v10 = vadd.f32 1e-08, %v98_v8  ;;  %v923_v8 = vld [vmem:[#allocation8 + $0x40] sm:$0xf] }
  0x96   :  { %v102_v11 = vmul.f32 %v1128_v9, %v99_v6  ;;  %vm108_vm0 = vweird.f32 %v1128_v9  ;;  %v860_v6 = vor.u32 %v1030_v4, %v859_v3  ;;  %v832_v3 = vor.u32 %v1021_v56, %v829_v58 }
  0x97   :  { %1129 = vrsqrt.f32 %v100_v10  ;;  %vm109_vm2 = vmor %vm107_vm1, %vm108_vm0  ;;  %vm117_vm4 = vweird.f32 %v100_v10  ;;  %v892_v4 = vor.u32 %v1038_v60, %v891_v59 }
  0x98   :  { %v103_v12 = vmul.f32 %v1128_v9, %v102_v11  ;;  %276 = vmatpush.bf16.msra.mxu0 %v860_v6  ;;  %v896_v6 = vor.u32 %v1037_v61, %v893_v62 }
  0x9a   :  { %v104_v13 = vmul.f32 0.5, %v103_v12  ;;  %v1045_v12 = vld [vmem:[#allocation8 + $0x44] sm:$0xf] }
  0x9c   :  { %v105_v14 = vsub.f32 1.5, %v104_v13  ;;  %v925_v13 = vld [vmem:[#allocation8 + $0x48] sm:$0xf0] }
  0x9d   :  { %v1130_v15 = vpop.eup %1129 }
  0x9e   :  { %v112_v16 = vmul.f32 %v1130_v15, %v100_v10  ;;  %v106_v17 = vmul.f32 %v1128_v9, %v105_v14  ;;  %vm118_vm3 = vweird.f32 %v1130_v15  ;;  %v864_v10 = vor.u32 %v1029_v5, %v861_v7  ;;  %v851_v14 = vld [vmem:[#allocation6 + $0x30] sm:$0xf] }
  0x9f   :  { %vm119_vm5 = vmor %vm117_vm4, %vm118_vm3 }
  0xa0   :  { %v113_v19 = vmul.f32 %v1130_v15, %v112_v16  ;;  %v110_v20 = vsel %vm109_vm2, %v1128_v9, %v106_v17  ;;  %v1046_v9 = vld [vmem:[#allocation8 + $0x44] sm:$0xf0]  ;;  %v1028_v16 = vld [vmem:[#allocation6 + $0x34] sm:$0xf0]  ;;  %v1027_v17 = vld [vmem:[#allocation6 + $0x34] sm:$0xf]  ;;  %290 = vmatpush.bf16.msra.mxu1 %v864_v10 }
  0xa1   :  { %v121_v21 = vmul.f32 %v110_v20, %v87_v0  ;;  %v1047_v0 = vld [vmem:[#allocation8 + $0x54] sm:$0xf]  ;;  %v924_v11 = vor.u32 %v1046_v9, %v923_v8 }
  0xa2   :  { %v114_v22 = vmul.f32 0.5, %v113_v19  ;;  %v852_v19 = vor.u32 %v1028_v16, %v851_v14 }
  0xa3   :  { %v1355_v23 = vmul.f32 %v1126_v18, %v121_v21  ;;  %404 = vmatpush.bf16.msra.mxu2 %v924_v11  ;;  %v915_v21 = vld [vmem:[#allocation8 + $0x30] sm:$0xf] }
  0xa4   :  { %v115_v24 = vsub.f32 1.5, %v114_v22  ;;  %v1044_v22 = vld [vmem:[#allocation8 + $0x34] sm:$0xf0]  ;;  %277 = vmatpush.bf16.msra.mxu0 %v852_v19 }
  0xa5   :  { %v128_v25 = vand.u32 2147483647, %v1355_v23 }
  0xa6   :  { %v116_v26 = vmul.f32 %v1130_v15, %v115_v24  ;;  %v1043_v24 = vld [vmem:[#allocation8 + $0x34] sm:$0xf] }
  0xa7   :  { %130 = vmax.xlane.f32.xlu1 %v128_v25  ;;  %v916_v25 = vor.u32 %v1044_v22, %v915_v21 }
  0xa8   :  { %v120_v27 = vsel %vm119_vm5, %v1130_v15, %v116_v26  ;;  %v928_v15 = vor.u32 %v1045_v12, %v925_v13  ;;  %v917_v26 = vld [vmem:[#allocation8 + $0x38] sm:$0xf0] }
  0xa9   :  { %v122_v28 = vmul.f32 %v120_v27, %v88_v2  ;;  %v936_v2 = vor.u32 %v1047_v0, %v933_v1  ;;  %v843_v27 = vld [vmem:[#allocation6 + $0x20] sm:$0xf]  ;;  %405 = vmatpush.bf16.msra.mxu2 %v916_v25  ;;  %v828_v0 = vor.u32 %v1022_v55, %v827_v54 }
  0xab   :  { %v1358_v29 = vmul.f32 %v1126_v18, %v122_v28  ;;  %417 = vmatpush.bf16.msra.mxu3 %v936_v2  ;;  %v853_v18 = vld [vmem:[#allocation6 + $0x38] sm:$0xf0]  ;;  %v1026_v28 = vld [vmem:[#allocation6 + $0x24] sm:$0xf0] }
  0xac   :  { %v856_v20 = vor.u32 %v1027_v17, %v853_v18  ;;  %v844_v35 = vor.u32 %v1026_v28, %v843_v27 }
  0xad   :  { %v129_v30 = vand.u32 2147483647, %v1358_v29  ;;  %406 = vmatpush.bf16.msra.mxu2 %v908_v41 }
  0xae   :  { %291 = vmatpush.bf16.msra.mxu1 %v856_v20  ;;  %278 = vmatpush.bf16.msra.mxu0 %v844_v35 }
  0xaf   :  { %132 = vmax.xlane.f32.xlu1 %v129_v30  ;;  %418 = vmatpush.bf16.msra.mxu3 %v928_v15  ;;  %v920_v30 = vor.u32 %v1043_v24, %v917_v26 }
  0xb1   :  { %407 = vmatpush.bf16.msra.mxu2 %v900_v53 }
  0xb2   :  { %292 = vmatpush.bf16.msra.mxu1 %v848_v40  ;;  %279 = vmatpush.bf16.msra.mxu0 %v836_v49 }
  0xb3   :  { %419 = vmatpush.bf16.msra.mxu3 %v920_v30 }
  0xb5   :  { %408 = vmatpush.bf16.msra.mxu2 %v892_v4 }
  0xb6   :  { %293 = vmatpush.bf16.msra.mxu1 %v840_v52  ;;  %280 = vmatpush.bf16.msra.mxu0 %v828_v0 }
  0xb7   :  { %420 = vmatpush.bf16.msra.mxu3 %v912_v44 }
  0xba   :  { %294 = vmatpush.bf16.msra.mxu1 %v832_v3 }
  0xbb   :  { %421 = vmatpush.bf16.msra.mxu3 %v904_v57 }
  0xbf   :  { %422 = vmatpush.bf16.msra.mxu3 %v896_v6 }
 0x11a   :  { %v131_v34 = vpop.xlane.xlu1 %130 }
 0x11b   :  { %v1361_v39 = vmax.f32 %v131_v34, 1e-05 }
 0x11d   :  { %1131 = vrcp.f32 %v1361_v39  ;;  %v147_v8 = vand.u32 2147483648, %v1361_v39  ;;  %v145_v10 = vand.u32 2147483647, %v1361_v39  ;;  %vm141_vm7 = vweird.f32 %v1361_v39 }
 0x11f   :  { %v148_v13 = vor.u32 1.1754944e-38, %v147_v8  ;;  %vm146_vm9 = vcmp.eq.f32.partialorder %v145_v10, 8.507059e+37 }
 0x122   :  { %v133_v63 = vpop.xlane.xlu1 %132 }
 0x123   :  { %v1132_v1 = vpop.eup %1131  ;;  %v1364_v2 = vmax.f32 %v133_v63, 1e-05 }
 0x124   :  { %v137_v5 = vmul.f32 %v1132_v1, %v1361_v39  ;;  %vm142_vm6 = vweird.f32 %v1132_v1 }
 0x125   :  { %1133 = vrcp.f32 %v1364_v2  ;;  %vm143_vm8 = vmor %vm141_vm7, %vm142_vm6  ;;  %v162_v19 = vand.u32 2147483648, %v1364_v2  ;;  %v160_v21 = vand.u32 2147483647, %v1364_v2  ;;  %vm156_vm11 = vweird.f32 %v1364_v2 }
 0x126   :  { %v138_v7 = vsub.f32 1.0, %v137_v5  ;;  %v1389_v56 = vmul.f32 0.007874016, %v1364_v2 }
 0x127   :  { %v163_v26 = vor.u32 1.1754944e-38, %v162_v19  ;;  %vm161_vm13 = vcmp.eq.f32.partialorder %v160_v21, 8.507059e+37 }
 0x128   :  { %v139_v9 = vmul.f32 %v1132_v1, %v138_v7 }
 0x12a   :  { %v140_v11 = vadd.f32 %v1132_v1, %v139_v9 }
 0x12b   :  { %v1134_v12 = vpop.eup %1133 }
 0x12c   :  { %v144_v14 = vsel %vm143_vm8, %v1132_v1, %v140_v11  ;;  %v152_v15 = vmul.f32 %v1134_v12, %v1364_v2  ;;  %vm157_vm10 = vweird.f32 %v1134_v12 }
 0x12d   :  { %v149_v16 = vsel %vm146_vm9, %v148_v13, %v144_v14  ;;  %vm158_vm12 = vmor %vm156_vm11, %vm157_vm10  ;;  %v90_v14 = vld [vmem:[%s1487_s5] sm:$0x3]  ;;  %s1295_s5 = smov [#allocation11]  }
 0x12e   :  { %v153_v17 = vsub.f32 1.0, %v152_v15  ;;  %v150_v18 = vmul.f32 127.0, %v149_v16  ;;  %v1408_v21 = vperm.slane %v90_v14, 0  ;;  %s808_s20 = sshll.u32 %s1295_s5, 4  ;;  %s809_s20 = int_to_ptr.vmem [resolvable:$true] %s808_s20 }
 0x130   :  { %v154_v20 = vmul.f32 %v1134_v12, %v153_v17  ;;  %v166_v22 = vmul.f32 %v150_v18, %v1355_v23 }
 0x132   :  { %v155_v24 = vadd.f32 %v1134_v12, %v154_v20  ;;  %v1071_v25 = vcvt.f32.s32 %v166_v22  ;;  %v1074_v34 = vand.u32 2147483648, %v166_v22  ;;  %v1069_v35 = vand.u32 2147483647, %v166_v22 }
 0x134   :  { %v159_v27 = vsel %vm158_vm12, %v1134_v12, %v155_v24  ;;  %v1072_v28 = vcvt.s32.f32 %v1071_v25  ;;  %vm1070_vm14 = vcmp.lt.f32.partialorder %v1069_v35, 8388608.0 }
 0x135   :  { %v164_v30 = vsel %vm161_vm13, %v163_v26, %v159_v27  ;;  %v1410_v26 = vperm.slane %v90_v14, 1 }
 0x136   :  { %v165_v31 = vmul.f32 127.0, %v164_v30  ;;  %v1073_v32 = vand.u32 2147483647, %v1072_v28 }
 0x138   :  { %v167_v33 = vmul.f32 %v165_v31, %v1358_v29  ;;  %v1075_v36 = vor.u32 %v1074_v34, %v1073_v32  ;;  %v1378_v29 = vmul.f32 0.007874016, %v1361_v39 }
 0x13a   :  { %v1079_v37 = vcvt.f32.s32 %v167_v33  ;;  %v1077_v23 = vand.u32 2147483647, %v167_v33  ;;  %v1076_v40 = vsel %vm1070_vm14, %v1075_v36, %v166_v22  ;;  %v1082_v42 = vand.u32 2147483648, %v167_v33 }
 0x13b   :  { %v170_v44 = vmax.f32 %v1076_v40, -128.0 }
 0x13c   :  { %v1080_v38 = vcvt.s32.f32 %v1079_v37  ;;  %vm1078_vm15 = vcmp.lt.f32.partialorder %v1077_v23, 8388608.0 }
 0x13d   :  { %v172_v47 = vmin.f32 %v170_v44, 127.0 }
 0x13e   :  { %v1081_v41 = vand.u32 2147483647, %v1080_v38 }
 0x140   :  { %v1083_v43 = vor.u32 %v1082_v42, %v1081_v41 }
 0x142   :  { %v1084_v45 = vsel %vm1078_vm15, %v1083_v43, %v167_v33 }
 0x143   :  { %v171_v46 = vmax.f32 %v1084_v45, -128.0 }
 0x145   :  { %v173_v48 = vmin.f32 %v171_v46, 127.0 }
 0x147   :  { %v174_v49 = vpack.c.bf16 %v173_v48, %v172_v47 }
 0x149   :  { %281 = vmatmul.bf16.vlgmr.msra.gmra.mxu0 %v174_v49  ;;  %295 = vmatmul.bf16.vlgmr.msra.gmra.mxu1 %v174_v49 }
 0x14a   :  { %409 = vmatmul.bf16.vlgmr.msra.gmra.mxu2 %v174_v49  ;;  %423 = vmatmul.bf16.vlgmr.msra.gmra.mxu3 %v174_v49 }
 0x1c6   :  { %v282_v50 = vpop.f32.mrf.mxu0  ;;  %v296_v51 = vpop.f32.mrf.mxu1 }
 0x1c7   :  { %v1381_v52 = vmul.f32 %v282_v50, %v1378_v29  ;;  %v1384_v53 = vmul.f32 %v296_v51, %v1378_v29 }
 0x1c9   :  { %v953_v54 = vmul.f32 -1.442695, %v1381_v52  ;;  %v954_v55 = vmul.f32 -1.442695, %v1384_v53 }
 0x1cb   :  { %1135 = vpow2.f32 %v953_v54 }
 0x1cc   :  { %1137 = vpow2.f32 %v954_v55 }
 0x1cd   :  { %v410_v19 = vpop.f32.mrf.mxu2  ;;  %v424_v30 = vpop.f32.mrf.mxu3 }
 0x1ce   :  { %v284_v57 = vpop.f32.mrf.mxu0  ;;  %v298_v39 = vpop.f32.mrf.mxu1  ;;  %v429_v38 = vmul.f32 %v410_v19, %v1378_v29  ;;  %v430_v41 = vmul.f32 %v424_v30, %v1378_v29 }
 0x1cf   :  { %v1392_v58 = vmul.f32 %v284_v57, %v1389_v56  ;;  %v1395_v59 = vmul.f32 %v298_v39, %v1389_v56 }
 0x1d1   :  { %v1136_v60 = vpop.eup %1135  ;;  %v955_v61 = vmul.f32 -1.442695, %v1392_v58  ;;  %v956_v0 = vmul.f32 -1.442695, %v1395_v59 }
 0x1d2   :  { %v1138_v62 = vpop.eup %1137  ;;  %v445_v63 = vadd.f32 1.0, %v1136_v60 }
 0x1d3   :  { %v446_v1 = vadd.f32 1.0, %v1138_v62  ;;  %1139 = vpow2.f32 %v955_v61 }
 0x1d4   :  { %1141 = vrcp.f32 %v445_v63  ;;  %v458_v11 = vand.u32 2147483647, %v445_v63  ;;  %v460_v12 = vand.u32 2147483648, %v445_v63  ;;  %vm454_vm2 = vweird.f32 %v445_v63 }
 0x1d5   :  { %1143 = vrcp.f32 %v446_v1  ;;  %v475_v16 = vand.u32 2147483648, %v446_v1  ;;  %v473_v18 = vand.u32 2147483647, %v446_v1  ;;  %vm469_vm4 = vweird.f32 %v446_v1  ;;  %v412_v54 = vpop.f32.mrf.mxu2 }
 0x1d6   :  { %1145 = vpow2.f32 %v956_v0  ;;  %v461_v24 = vor.u32 1.1754944e-38, %v460_v12  ;;  %vm459_vm5 = vcmp.eq.f32.partialorder %v458_v11, 8.507059e+37 }
 0x1d7   :  { %v476_v28 = vor.u32 1.1754944e-38, %v475_v16  ;;  %vm474_vm7 = vcmp.eq.f32.partialorder %v473_v18, 8.507059e+37 }
 0x1d9   :  { %v1140_v2 = vpop.eup %1139 }
 0x1da   :  { %v1142_v3 = vpop.eup %1141  ;;  %v1399_v4 = vadd.f32 1.0, %v1140_v2 }
 0x1db   :  { %v1144_v5 = vpop.eup %1143  ;;  %v450_v6 = vmul.f32 %v1142_v3, %v445_v63  ;;  %vm455_vm0 = vweird.f32 %v1142_v3 }
 0x1dc   :  { %v1146_v7 = vpop.eup %1145  ;;  %v465_v8 = vmul.f32 %v1144_v5, %v446_v1  ;;  %1147 = vrcp.f32 %v1399_v4  ;;  %vm470_vm1 = vweird.f32 %v1144_v5  ;;  %vm456_vm3 = vmor %vm454_vm2, %vm455_vm0  ;;  %v490_v34 = vand.u32 2147483648, %v1399_v4 }
 0x1dd   :  { %v451_v9 = vsub.f32 1.0, %v450_v6  ;;  %v1402_v10 = vadd.f32 1.0, %v1146_v7  ;;  %vm471_vm6 = vmor %vm469_vm4, %vm470_vm1  ;;  %vm484_vm8 = vweird.f32 %v1399_v4  ;;  %v488_v45 = vand.u32 2147483647, %v1399_v4 }
 0x1de   :  { %v466_v13 = vsub.f32 1.0, %v465_v8  ;;  %v491_v47 = vor.u32 1.1754944e-38, %v490_v34 }
 0x1df   :  { %v452_v15 = vmul.f32 %v1142_v3, %v451_v9  ;;  %1149 = vrcp.f32 %v1402_v10  ;;  %v503_v49 = vand.u32 2147483647, %v1402_v10  ;;  %v505_v51 = vand.u32 2147483648, %v1402_v10 }
 0x1e0   :  { %v467_v17 = vmul.f32 %v1144_v5, %v466_v13  ;;  %vm489_vm12 = vcmp.eq.f32.partialorder %v488_v45, 8.507059e+37  ;;  %vm499_vm13 = vweird.f32 %v1402_v10 }
 0x1e1   :  { %v453_v20 = vadd.f32 %v1142_v3, %v452_v15  ;;  %v506_v2 = vor.u32 1.1754944e-38, %v505_v51  ;;  %vm504_vm15 = vcmp.eq.f32.partialorder %v503_v49, 8.507059e+37  ;;  %v1064_v51 = vld [vmem:[#allocation9 + $0x58] sm:$0xff] }
 0x1e2   :  { %v1148_v22 = vpop.eup %1147  ;;  %v468_v25 = vadd.f32 %v1144_v5, %v467_v17 }
 0x1e3   :  { %v457_v27 = vsel %vm456_vm3, %v1142_v3, %v453_v20  ;;  %v480_v31 = vmul.f32 %v1148_v22, %v1399_v4  ;;  %vm485_vm9 = vweird.f32 %v1148_v22  ;;  %v431_v3 = vmul.f32 %v412_v54, %v1389_v56  ;;  %v426_v4 = vpop.f32.mrf.mxu3  ;;  %v1060_v20 = vld [vmem:[#allocation9 + $0x38] sm:$0xff]  ;;  %v1063_v54 = vld [vmem:[#allocation9 + $0x50] sm:$0xff] }
 0x1e4   :  { %v462_v32 = vsel %vm459_vm5, %v461_v24, %v457_v27  ;;  %v472_v33 = vsel %vm471_vm6, %v1144_v5, %v468_v25  ;;  %vm486_vm10 = vmor %vm484_vm8, %vm485_vm9  ;;  %770 = vmatpush.bf16.msrb.mxu0 %v1060_v20 }
 0x1e5   :  { %v1150_v35 = vpop.eup %1149  ;;  %v509_v36 = vmul.f32 %v462_v32, %v1381_v52  ;;  %v477_v37 = vsel %vm474_vm7, %v476_v28, %v472_v33  ;;  %v481_v23 = vsub.f32 1.0, %v480_v31  ;;  %v1059_v31 = vld [vmem:[#allocation9 + $0x30] sm:$0xff] }
 0x1e6   :  { %v510_v40 = vmul.f32 %v477_v37, %v1384_v53  ;;  %v495_v42 = vmul.f32 %v1150_v35, %v1402_v10  ;;  %vm500_vm11 = vweird.f32 %v1150_v35  ;;  %v432_v10 = vmul.f32 %v426_v4, %v1389_v56  ;;  %v1067_v32 = vld [vmem:[#allocation9 + $0x70] sm:$0xff]  ;;  %v1053_v4 = vld [vmem:[#allocation9] sm:$0xff] }
 0x1e7   :  { %v1420_v43 = vmul.f32 %v509_v36, %v429_v38  ;;  %v482_v44 = vmul.f32 %v1148_v22, %v481_v23  ;;  %vm501_vm14 = vmor %vm499_vm13, %vm500_vm11  ;;  %v1066_v36 = vld [vmem:[#allocation9 + $0x68] sm:$0xff] }
 0x1e8   :  { %v1423_v46 = vmul.f32 %v510_v40, %v430_v41  ;;  %v496_v48 = vsub.f32 1.0, %v495_v42  ;;  %771 = vmatpush.bf16.msrb.mxu0 %v1059_v31  ;;  %v1057_v42 = vld [vmem:[#allocation9 + $0x20] sm:$0xff] }
 0x1e9   :  { %v483_v50 = vadd.f32 %v1148_v22, %v482_v44  ;;  %v521_v29 = vmul.f32 %v1420_v43, %v1420_v43  ;;  %v538_v52 = vmul.f32 %v1408_v21, %v1420_v43  ;;  %v1065_v44 = vld [vmem:[#allocation9 + $0x60] sm:$0xff] }
 0x1ea   :  { %v497_v53 = vmul.f32 %v1150_v35, %v496_v48  ;;  %v522_v55 = vmul.f32 %v1423_v46, %v1423_v46  ;;  %v539_v57 = vmul.f32 %v1410_v26, %v1423_v46 }
 0x1eb   :  { %v487_v39 = vsel %vm486_vm10, %v1148_v22, %v483_v50  ;;  %v542_v60 = vand.u32 2147483647, %v538_v52  ;;  %v1068_v22 = vld [vmem:[#allocation9 + $0x78] sm:$0xff] }
 0x1ec   :  { %v492_v61 = vsel %vm489_vm12, %v491_v47, %v487_v39  ;;  %v498_v62 = vadd.f32 %v1150_v35, %v497_v53  ;;  %v525_v63 = vadd.f32 %v522_v55, %v521_v29  ;;  %v543_v0 = vand.u32 2147483647, %v539_v57  ;;  %784 = vmatpush.bf16.msrb.mxu1 %v1068_v22  ;;  %v1056_v50 = vld [vmem:[#allocation9 + $0x18] sm:$0xff]  ;;  %v1055_v53 = vld [vmem:[#allocation9 + $0x10] sm:$0xff] }
 0x1ed   :  { %v511_v1 = vmul.f32 %v492_v61, %v1392_v58  ;;  %v1054_v61 = vld [vmem:[#allocation9 + $0x8] sm:$0xff] }
 0x1ee   :  { %v502_v5 = vsel %vm501_vm14, %v1150_v35, %v498_v62  ;;  %526 = vadd.xlane.f32.xlu2 %v525_v63  ;;  %v546_v6 = vmax.f32 %v542_v60, %v543_v0  ;;  %v1058_v35 = vld [vmem:[#allocation9 + $0x28] sm:$0xff] }
 0x1ef   :  { %v507_v7 = vsel %vm504_vm15, %v506_v2, %v502_v5  ;;  %v1438_v8 = vmul.f32 %v511_v1, %v431_v3  ;;  %772 = vmatpush.bf16.msrb.mxu0 %v1058_v35  ;;  %v1062_v62 = vld [vmem:[#allocation9 + $0x48] sm:$0xff]  ;;  %v1061_v5 = vld [vmem:[#allocation9 + $0x40] sm:$0xff] }
 0x1f0   :  { %v512_v9 = vmul.f32 %v507_v7, %v1395_v59  ;;  %547 = vmax.xlane.f32.xlu0 %v546_v6  ;;  %785 = vmatpush.bf16.msrb.mxu1 %v1067_v32 }
 0x1f1   :  { %v540_v58 = vmul.f32 %v1408_v21, %v1438_v8  ;;  %v523_v12 = vmul.f32 %v1438_v8, %v1438_v8 }
 0x1f2   :  { %v1444_v11 = vmul.f32 %v512_v9, %v432_v10 }
 0x1f3   :  { %v544_v15 = vand.u32 2147483647, %v540_v58  ;;  %773 = vmatpush.bf16.msrb.mxu0 %v1057_v42 }
 0x1f4   :  { %v524_v13 = vmul.f32 %v1444_v11, %v1444_v11  ;;  %v541_v14 = vmul.f32 %v1410_v26, %v1444_v11  ;;  %786 = vmatpush.bf16.msrb.mxu1 %v1066_v36 }
 0x1f6   :  { %v528_v16 = vadd.f32 %v524_v13, %v523_v12  ;;  %v545_v59 = vand.u32 2147483647, %v541_v14 }
 0x1f7   :  { %774 = vmatpush.bf16.msrb.mxu0 %v1056_v50 }
 0x1f8   :  { %529 = vadd.xlane.f32.xlu2 %v528_v16  ;;  %v549_v56 = vmax.f32 %v544_v15, %v545_v59  ;;  %787 = vmatpush.bf16.msrb.mxu1 %v1065_v44 }
 0x1fa   :  { %550 = vmax.xlane.f32.xlu1 %v549_v56 }
 0x1fb   :  { %775 = vmatpush.bf16.msrb.mxu0 %v1055_v53 }
 0x1fc   :  { %788 = vmatpush.bf16.msrb.mxu1 %v1064_v51 }
 0x1ff   :  { %776 = vmatpush.bf16.msrb.mxu0 %v1054_v61 }
 0x200   :  { %789 = vmatpush.bf16.msrb.mxu1 %v1063_v54 }
 0x203   :  { %777 = vmatpush.bf16.msrb.mxu0 %v1053_v4 }
 0x204   :  { %790 = vmatpush.bf16.msrb.mxu1 %v1062_v62 }
 0x208   :  { %791 = vmatpush.bf16.msrb.mxu1 %v1061_v5 }
 0x261   :  { %v527_v17 = vpop.xlane.xlu2 %526 }
 0x262   :  { %v554_v18 = vmul.f32 0.00390625, %v527_v17 }
 0x263   :  { %v548_v38 = vpop.xlane.xlu0 %547 }
 0x264   :  { %v556_v19 = vadd.f32 1e-08, %v554_v18  ;;  %v552_v41 = vmax.f32 %v548_v38, 0.0 }
 0x266   :  { %1151 = vrsqrt.f32 %v556_v19  ;;  %vm564_vm1 = vweird.f32 %v556_v19 }
 0x26b   :  { %v530_v24 = vpop.xlane.xlu2 %529 }
 0x26c   :  { %v1152_v25 = vpop.eup %1151  ;;  %v555_v27 = vmul.f32 0.00390625, %v530_v24 }
 0x26d   :  { %v559_v28 = vmul.f32 %v1152_v25, %v556_v19  ;;  %vm565_vm0 = vweird.f32 %v1152_v25  ;;  %v551_v57 = vpop.xlane.xlu1 %550 }
 0x26e   :  { %v557_v30 = vadd.f32 1e-08, %v555_v27  ;;  %vm566_vm2 = vmor %vm564_vm1, %vm565_vm0  ;;  %v553_v60 = vmax.f32 %v551_v57, 0.0 }
 0x26f   :  { %v560_v33 = vmul.f32 %v1152_v25, %v559_v28 }
 0x270   :  { %1153 = vrsqrt.f32 %v557_v30  ;;  %vm574_vm4 = vweird.f32 %v557_v30 }
 0x271   :  { %v561_v34 = vmul.f32 0.5, %v560_v33 }
 0x273   :  { %v562_v37 = vsub.f32 1.5, %v561_v34 }
 0x275   :  { %v563_v23 = vmul.f32 %v1152_v25, %v562_v37 }
 0x276   :  { %v1154_v40 = vpop.eup %1153 }
 0x277   :  { %v567_v45 = vsel %vm566_vm2, %v1152_v25, %v563_v23  ;;  %v569_v47 = vmul.f32 %v1154_v40, %v557_v30  ;;  %vm575_vm3 = vweird.f32 %v1154_v40 }
 0x278   :  { %v578_v48 = vmul.f32 %v567_v45, %v552_v41  ;;  %vm576_vm5 = vmor %vm574_vm4, %vm575_vm3  ;;  %v616_v12 = vmul.f32 %v567_v45, %v1420_v43  ;;  %v617_v13 = vmul.f32 %v567_v45, %v1423_v46 }
 0x279   :  { %v570_v49 = vmul.f32 %v1154_v40, %v569_v47 }
 0x27a   :  { %v1452_v29 = vmax.f32 %v578_v48, 1e-05  ;;  %v620_v17 = vmul.f32 %v616_v12, %v1408_v21  ;;  %v621_v18 = vmul.f32 %v617_v13, %v1410_v26 }
 0x27b   :  { %v571_v52 = vmul.f32 0.5, %v570_v49 }
 0x27c   :  { %1155 = vrcp.f32 %v1452_v29  ;;  %v593_v7 = vand.u32 2147483648, %v1452_v29  ;;  %v591_v10 = vand.u32 2147483647, %v1452_v29  ;;  %vm587_vm7 = vweird.f32 %v1452_v29 }
 0x27d   :  { %v572_v55 = vsub.f32 1.5, %v571_v52 }
 0x27e   :  { %v594_v14 = vor.u32 1.1754944e-38, %v593_v7  ;;  %vm592_vm9 = vcmp.eq.f32.partialorder %v591_v10, 8.507059e+37 }
 0x27f   :  { %v573_v39 = vmul.f32 %v1154_v40, %v572_v55 }
 0x281   :  { %v577_v63 = vsel %vm576_vm5, %v1154_v40, %v573_v39 }
 0x282   :  { %v1156_v0 = vpop.eup %1155  ;;  %v579_v1 = vmul.f32 %v577_v63, %v553_v60  ;;  %v618_v28 = vmul.f32 %v577_v63, %v1438_v8  ;;  %v619_v32 = vmul.f32 %v577_v63, %v1444_v11 }
 0x283   :  { %v583_v2 = vmul.f32 %v1156_v0, %v1452_v29  ;;  %vm588_vm6 = vweird.f32 %v1156_v0 }
 0x284   :  { %v1456_v3 = vmax.f32 %v579_v1, 1e-05  ;;  %vm589_vm8 = vmor %vm587_vm7, %vm588_vm6  ;;  %v622_v23 = vmul.f32 %v618_v28, %v1408_v21  ;;  %v623_v40 = vmul.f32 %v619_v32, %v1410_v26 }
 0x285   :  { %v584_v6 = vsub.f32 1.0, %v583_v2 }
 0x286   :  { %1157 = vrcp.f32 %v1456_v3  ;;  %v608_v43 = vand.u32 2147483648, %v1456_v3  ;;  %v606_v46 = vand.u32 2147483647, %v1456_v3  ;;  %vm602_vm11 = vweird.f32 %v1456_v3 }
 0x287   :  { %v585_v9 = vmul.f32 %v1156_v0, %v584_v6 }
 0x288   :  { %v609_v34 = vor.u32 1.1754944e-38, %v608_v43  ;;  %vm607_vm13 = vcmp.eq.f32.partialorder %v606_v46, 8.507059e+37 }
 0x289   :  { %v586_v58 = vadd.f32 %v1156_v0, %v585_v9 }
 0x28b   :  { %v590_v15 = vsel %vm589_vm8, %v1156_v0, %v586_v58 }
 0x28c   :  { %v1158_v16 = vpop.eup %1157  ;;  %v595_v59 = vsel %vm592_vm9, %v594_v14, %v590_v15 }
 0x28d   :  { %v596_v56 = vmul.f32 127.0, %v595_v59  ;;  %v598_v19 = vmul.f32 %v1158_v16, %v1456_v3  ;;  %vm603_vm10 = vweird.f32 %v1158_v16 }
 0x28e   :  { %vm604_vm12 = vmor %vm602_vm11, %vm603_vm10 }
 0x28f   :  { %v624_v20 = vmul.f32 %v620_v17, %v596_v56  ;;  %v625_v22 = vmul.f32 %v621_v18, %v596_v56  ;;  %v599_v24 = vsub.f32 1.0, %v598_v19  ;;  %v798_v56 = vmul.f32 0.007874016, %v1452_v29 }
 0x291   :  { %v600_v25 = vmul.f32 %v1158_v16, %v599_v24  ;;  %v1087_v27 = vcvt.f32.s32 %v624_v20  ;;  %v1095_v30 = vcvt.f32.s32 %v625_v22  ;;  %v1090_v45 = vand.u32 2147483648, %v624_v20 }
 0x292   :  { %v1085_v47 = vand.u32 2147483647, %v624_v20  ;;  %v1093_v48 = vand.u32 2147483647, %v625_v22  ;;  %v1098_v11 = vand.u32 2147483648, %v625_v22 }
 0x293   :  { %v601_v31 = vadd.f32 %v1158_v16, %v600_v25  ;;  %v1088_v33 = vcvt.s32.f32 %v1087_v27  ;;  %v1096_v35 = vcvt.s32.f32 %v1095_v30 }
 0x294   :  { %vm1086_vm14 = vcmp.lt.f32.partialorder %v1085_v47, 8388608.0  ;;  %vm1094_vm15 = vcmp.lt.f32.partialorder %v1093_v48, 8388608.0 }
 0x295   :  { %v605_v36 = vsel %vm604_vm12, %v1158_v16, %v601_v31  ;;  %v1089_v41 = vand.u32 2147483647, %v1088_v33  ;;  %v1097_v8 = vand.u32 2147483647, %v1096_v35 }
 0x296   :  { %v610_v37 = vsel %vm607_vm13, %v609_v34, %v605_v36 }
 0x297   :  { %v611_v38 = vmul.f32 127.0, %v610_v37  ;;  %v1091_v49 = vor.u32 %v1090_v45, %v1089_v41  ;;  %v1099_v51 = vor.u32 %v1098_v11, %v1097_v8 }
 0x299   :  { %v626_v42 = vmul.f32 %v622_v23, %v611_v38  ;;  %v627_v44 = vmul.f32 %v623_v40, %v611_v38  ;;  %v1092_v21 = vsel %vm1086_vm14, %v1091_v49, %v624_v20  ;;  %v1100_v60 = vsel %vm1094_vm15, %v1099_v51, %v625_v22 }
 0x29a   :  { %v632_v0 = vmax.f32 %v1092_v21, -128.0  ;;  %v633_v4 = vmax.f32 %v1100_v60, -128.0  ;;  %v799_v22 = vmul.f32 0.007874016, %v1456_v3 }
 0x29b   :  { %v1103_v50 = vcvt.f32.s32 %v626_v42  ;;  %v1111_v52 = vcvt.f32.s32 %v627_v44  ;;  %v1101_v54 = vand.u32 2147483647, %v626_v42  ;;  %v1106_v26 = vand.u32 2147483648, %v626_v42 }
 0x29c   :  { %v1109_v39 = vand.u32 2147483647, %v627_v44  ;;  %v1114_v62 = vand.u32 2147483648, %v627_v44  ;;  %v636_v9 = vmin.f32 %v632_v0, 127.0  ;;  %v637_v58 = vmin.f32 %v633_v4, 127.0 }
 0x29d   :  { %v1104_v53 = vcvt.s32.f32 %v1103_v50  ;;  %v1112_v55 = vcvt.s32.f32 %v1111_v52  ;;  %vm1102_vm0 = vcmp.lt.f32.partialorder %v1101_v54, 8388608.0 }
 0x29e   :  { %vm1110_vm1 = vcmp.lt.f32.partialorder %v1109_v39, 8388608.0 }
 0x29f   :  { %v1105_v57 = vand.u32 2147483647, %v1104_v53  ;;  %v1113_v61 = vand.u32 2147483647, %v1112_v55 }
 0x2a1   :  { %v1107_v63 = vor.u32 %v1106_v26, %v1105_v57  ;;  %v1115_v1 = vor.u32 %v1114_v62, %v1113_v61 }
 0x2a3   :  { %v1108_v2 = vsel %vm1102_vm0, %v1107_v63, %v626_v42  ;;  %v1116_v6 = vsel %vm1110_vm1, %v1115_v1, %v627_v44 }
 0x2a4   :  { %v634_v5 = vmax.f32 %v1108_v2, -128.0  ;;  %v635_v7 = vmax.f32 %v1116_v6, -128.0 }
 0x2a6   :  { %v638_v10 = vmin.f32 %v634_v5, 127.0  ;;  %v639_v12 = vmin.f32 %v635_v7, 127.0 }
 0x2a8   :  { %v640_v13 = vpack.c.bf16 %v638_v10, %v636_v9  ;;  %v641_v14 = vpack.c.bf16 %v639_v12, %v637_v58 }
 0x2aa   :  { %778 = vmatmul.bf16.vlgmr.msrb.gmra.mxu0 %v640_v13  ;;  %792 = vmatmul.bf16.vlgmr.msrb.gmra.mxu1 %v641_v14 }
 0x327   :  { %v779_v15 = vpop.f32.mrf.mxu0  ;;  %v793_v16 = vpop.f32.mrf.mxu1 }
 0x328   :  { %v794_v59 = vadd.f32 %v793_v16, %v779_v15 }
 0x32a   :  { %v800_v17 = vmul.f32 %v798_v56, %v794_v59 }
 0x32c   :  { %802 = vst [vmem:[#allocation11] sm:$0xff] %v800_v17 }
 0x32f   :  { %v781_v18 = vpop.f32.mrf.mxu0  ;;  %v795_v19 = vpop.f32.mrf.mxu1 }
 0x330   :  { %v796_v20 = vadd.f32 %v795_v19, %v781_v18 }
 0x332   :  { %v801_v24 = vmul.f32 %v799_v22, %v796_v20 }
 0x334   :  { %803 = vst [vmem:[#allocation11 + $0x8] sm:$0xff] %v801_v24 }
 0x335   :  { %816 = dma.vmem_to_hbm [thread:$0]  %s809_s20, 256, %s811_s23, [#allocation5], %s1288_s29, %s1288_s29, %s1289_s30  }
 0x336   :  { %1285 = dma.done.wait [#allocation5], 256  }
 0x337   :  { %1286 = vsyncadd [#allocation5], 4294967040 }
 0x338   :  { %821 = vsyncpa [#allocation4], 1 }
 0x339   :  { %822 = vsyncpa [#allocation7], 1 }
 0x33a   :  { %823 = vsyncpa [#allocation10], 1 }
 0x33b   :  { %824 = vsyncpa [#allocation5], 1 }

// kernel: tpu_custom_call.1
= control target key start
LH: loop header
LB: loop body
LE: loop exit
PB: predicated region body
PF: predicated region fallthrough
CT: control target
= control target key end

     0   :  { %11 = vsyncpa [#allocation4], 0  ;;  %s1482_s0 = inlined_call_operand.hbm [shape: f32[16,128], index: 0, kind: input, shape index: {}]   ;;  %s1483_s1 = inlined_call_operand.hbm [shape: bf16[128,256], index: 1, kind: input, shape index: {}]   ;;  %s1484_s2 = inlined_call_operand.hbm [shape: bf16[128,256], index: 2, kind: input, shape index: {}]   ;;  %s1485_s3 = inlined_call_operand.hbm [shape: bf16[256,128], index: 3, kind: input, shape index: {}]   ;;  %s1486_s4 = inlined_call_operand.vmem [shape: f32[1,128], index: 4, kind: input, shape index: {}]   ;;  %s1487_s5 = inlined_call_operand.vmem [shape: f32[1,256], index: 5, kind: input, shape index: {}]   ;;  %s1488_s6 = inlined_call_operand.hbm [shape: f32[16,128], index: 6, kind: output, shape index: {}]  }
   0x1   :  { %12 = vsyncpa [#allocation7], 0 }
   0x2   :  { %13 = vsyncpa [#allocation10], 0 }
   0x3   :  { %14 = vsyncpa [#allocation5], 0  ;;  %s32_s23 = sshll.u32 %s1483_s1, 4  ;;  %s1287_s24 = smov [#allocation6]   ;;  %s33_s23 = int_to_ptr.hbm [resolvable:$true] %s32_s23 }
   0x4   :  { %s34_s25 = sshll.u32 %s1287_s24, 4  ;;  %s19_s28 = sshll.u32 %s1482_s0, 4  ;;  %s35_s25 = int_to_ptr.vmem [resolvable:$true] %s34_s25  ;;  %s20_s28 = int_to_ptr.hbm [resolvable:$true] %s19_s28 }
   0x5   :  { %s1288_s29 = smov 128   ;;  %s1289_s30 = smov 8  }
   0x6   :  { %40 = dma.hbm_to_vmem [thread:$0]  %s33_s23, 2048, %s35_s25, [#allocation7], %s1288_s29, %s1288_s29, %s1289_s30  }
   0x7   :  { %s1290_s7 = smov [#allocation3]   ;;  %s45_s1 = sshll.u32 %s1484_s2, 4  ;;  %s46_s1 = int_to_ptr.hbm [resolvable:$true] %s45_s1 }
   0x8   :  { %s21_s8 = sshll.u32 %s1290_s7, 4  ;;  %s58_s12 = sshll.u32 %s1485_s3, 4  ;;  %s22_s8 = int_to_ptr.vmem [resolvable:$true] %s21_s8  ;;  %s59_s12 = int_to_ptr.hbm [resolvable:$true] %s58_s12 }
   0x9   :  { %27 = dma.hbm_to_vmem [thread:$0]  %s20_s28, 256, %s22_s8, [#allocation4], %s1288_s29, %s1288_s29, %s1289_s30  }
   0xa   :  { %s1291_s13 = smov [#allocation8]   ;;  %s1292_s15 = smov [#allocation9]  }
   0xb   :  { %s47_s14 = sshll.u32 %s1291_s13, 4  ;;  %s60_s2 = sshll.u32 %s1292_s15, 4  ;;  %s48_s14 = int_to_ptr.vmem [resolvable:$true] %s47_s14  ;;  %s61_s2 = int_to_ptr.vmem [resolvable:$true] %s60_s2 }
   0xc   :  { %53 = dma.hbm_to_vmem [thread:$0]  %s46_s1, 2048, %s48_s14, [#allocation7], %s1288_s29, %s1288_s29, %s1289_s30  }
   0xd   :  { %s1293_s16 = smov 64   ;;  %s1294_s17 = smov 4  }
   0xe   :  { %66 = dma.hbm_to_vmem [thread:$0]  %s59_s12, 2048, %s61_s2, [#allocation10], %s1293_s16, %s1293_s16, %s1294_s17  }
   0xf   :  { %1279 = dma.done.wait [#allocation4], 256  }
  0x10   :  { %1280 = vsyncadd [#allocation4], 4294967040 }
  0x11   :  { %1281 = dma.done.wait [#allocation7], 4096  }
  0x12   :  { %1282 = vsyncadd [#allocation7], 4294963200 }
  0x13   :  { %1283 = dma.done.wait [#allocation10], 2048  }
  0x14   :  { %1284 = vsyncadd [#allocation10], 4294965248  ;;  %v87_v0 = vld [vmem:[#allocation3] sm:$0xff]  ;;  %v88_v2 = vld [vmem:[#allocation3 + $0x8] sm:$0xff]  ;;  %s810_s23 = sshll.u32 %s1488_s6, 4  ;;  %s811_s23 = int_to_ptr.hbm [resolvable:$true] %s810_s23 }
  0x15   :  { %v91_v1 = vmul.f32 %v87_v0, %v87_v0  ;;  %v92_v3 = vmul.f32 %v88_v2, %v88_v2  ;;  %v1126_v18 = vld [vmem:[%s1486_s4] ss:$0 sm:$0xff]  ;;  %v1036_v32 = vld [vmem:[#allocation6 + $0x74] sm:$0xf0]  ;;  %v1035_v33 = vld [vmem:[#allocation6 + $0x74] sm:$0xf] }
  0x16   :  { %v883_v31 = vld [vmem:[#allocation6 + $0x70] sm:$0xf]  ;;  %v885_v35 = vld [vmem:[#allocation6 + $0x78] sm:$0xf0]  ;;  %v1052_v37 = vld [vmem:[#allocation8 + $0x74] sm:$0xf0] }
  0x17   :  { %93 = vadd.xlane.f32.xlu0 %v91_v1  ;;  %v884_v34 = vor.u32 %v1036_v32, %v883_v31  ;;  %v947_v36 = vld [vmem:[#allocation8 + $0x70] sm:$0xf]  ;;  %v888_v38 = vor.u32 %v1035_v33, %v885_v35  ;;  %v1051_v40 = vld [vmem:[#allocation8 + $0x74] sm:$0xf]  ;;  %v949_v41 = vld [vmem:[#allocation8 + $0x78] sm:$0xf0] }
  0x18   :  { %v948_v39 = vor.u32 %v1052_v37, %v947_v36  ;;  %v952_v42 = vor.u32 %v1051_v40, %v949_v41  ;;  %v875_v43 = vld [vmem:[#allocation6 + $0x60] sm:$0xf]  ;;  %v1034_v44 = vld [vmem:[#allocation6 + $0x64] sm:$0xf0]  ;;  %v1033_v45 = vld [vmem:[#allocation6 + $0x64] sm:$0xf] }
  0x19   :  { %273 = vmatpush.bf16.msra.mxu0 %v884_v34  ;;  %287 = vmatpush.bf16.msra.mxu1 %v888_v38  ;;  %v876_v46 = vor.u32 %v1034_v44, %v875_v43  ;;  %v877_v47 = vld [vmem:[#allocation6 + $0x68] sm:$0xf0]  ;;  %v939_v48 = vld [vmem:[#allocation8 + $0x60] sm:$0xf]  ;;  %v1050_v49 = vld [vmem:[#allocation8 + $0x64] sm:$0xf0] }
  0x1a   :  { %401 = vmatpush.bf16.msra.mxu2 %v948_v39  ;;  %415 = vmatpush.bf16.msra.mxu3 %v952_v42  ;;  %v880_v50 = vor.u32 %v1033_v45, %v877_v47  ;;  %v940_v51 = vor.u32 %v1050_v49, %v939_v48  ;;  %v1049_v52 = vld [vmem:[#allocation8 + $0x64] sm:$0xf]  ;;  %v941_v53 = vld [vmem:[#allocation8 + $0x68] sm:$0xf0]  ;;  %v867_v55 = vld [vmem:[#allocation6 + $0x50] sm:$0xf] }
  0x1b   :  { %v944_v54 = vor.u32 %v1049_v52, %v941_v53  ;;  %v1032_v56 = vld [vmem:[#allocation6 + $0x54] sm:$0xf0]  ;;  %v1031_v57 = vld [vmem:[#allocation6 + $0x54] sm:$0xf]  ;;  %v869_v59 = vld [vmem:[#allocation6 + $0x58] sm:$0xf0] }
  0x1c   :  { %v868_v58 = vor.u32 %v1032_v56, %v867_v55  ;;  %v931_v60 = vld [vmem:[#allocation8 + $0x50] sm:$0xf]  ;;  %v1048_v61 = vld [vmem:[#allocation8 + $0x54] sm:$0xf0]  ;;  %v872_v62 = vor.u32 %v1031_v57, %v869_v59  ;;  %v933_v1 = vld [vmem:[#allocation8 + $0x58] sm:$0xf0] }
  0x1d   :  { %274 = vmatpush.bf16.msra.mxu0 %v876_v46  ;;  %288 = vmatpush.bf16.msra.mxu1 %v880_v50  ;;  %v932_v63 = vor.u32 %v1048_v61, %v931_v60  ;;  %v1025_v31 = vld [vmem:[#allocation6 + $0x24] sm:$0xf]  ;;  %v845_v32 = vld [vmem:[#allocation6 + $0x28] sm:$0xf0]  ;;  %v907_v33 = vld [vmem:[#allocation8 + $0x20] sm:$0xf] }
  0x1e   :  { %402 = vmatpush.bf16.msra.mxu2 %v940_v51  ;;  %416 = vmatpush.bf16.msra.mxu3 %v944_v54  ;;  %v1042_v36 = vld [vmem:[#allocation8 + $0x24] sm:$0xf0]  ;;  %v1041_v37 = vld [vmem:[#allocation8 + $0x24] sm:$0xf]  ;;  %v909_v38 = vld [vmem:[#allocation8 + $0x28] sm:$0xf0]  ;;  %v848_v40 = vor.u32 %v1025_v31, %v845_v32 }
  0x1f   :  { %95 = vadd.xlane.f32.xlu0 %v92_v3  ;;  %v859_v3 = vld [vmem:[#allocation6 + $0x40] sm:$0xf]  ;;  %v908_v41 = vor.u32 %v1042_v36, %v907_v33  ;;  %v835_v42 = vld [vmem:[#allocation6 + $0x10] sm:$0xf]  ;;  %v1024_v43 = vld [vmem:[#allocation6 + $0x14] sm:$0xf0]  ;;  %v912_v44 = vor.u32 %v1041_v37, %v909_v38 }
  0x20   :  { %v1023_v45 = vld [vmem:[#allocation6 + $0x14] sm:$0xf]  ;;  %v837_v46 = vld [vmem:[#allocation6 + $0x18] sm:$0xf0]  ;;  %v899_v47 = vld [vmem:[#allocation8 + $0x10] sm:$0xf]  ;;  %v836_v49 = vor.u32 %v1024_v43, %v835_v42 }
  0x21   :  { %275 = vmatpush.bf16.msra.mxu0 %v868_v58  ;;  %289 = vmatpush.bf16.msra.mxu1 %v872_v62  ;;  %v1040_v48 = vld [vmem:[#allocation8 + $0x14] sm:$0xf0]  ;;  %v1039_v50 = vld [vmem:[#allocation8 + $0x14] sm:$0xf]  ;;  %v901_v51 = vld [vmem:[#allocation8 + $0x18] sm:$0xf0]  ;;  %v840_v52 = vor.u32 %v1023_v45, %v837_v46 }
  0x22   :  { %403 = vmatpush.bf16.msra.mxu2 %v932_v63  ;;  %v900_v53 = vor.u32 %v1040_v48, %v899_v47  ;;  %v827_v54 = vld [vmem:[#allocation6] sm:$0xf]  ;;  %v1022_v55 = vld [vmem:[#allocation6 + $0x4] sm:$0xf0]  ;;  %v1021_v56 = vld [vmem:[#allocation6 + $0x4] sm:$0xf]  ;;  %v904_v57 = vor.u32 %v1039_v50, %v901_v51 }
  0x23   :  { %v829_v58 = vld [vmem:[#allocation6 + $0x8] sm:$0xf0]  ;;  %v891_v59 = vld [vmem:[#allocation8] sm:$0xf]  ;;  %v1038_v60 = vld [vmem:[#allocation8 + $0x4] sm:$0xf0] }
  0x24   :  { %v1037_v61 = vld [vmem:[#allocation8 + $0x4] sm:$0xf]  ;;  %v893_v62 = vld [vmem:[#allocation8 + $0x8] sm:$0xf0] }
  0x8a   :  { %v94_v4 = vpop.xlane.xlu0 %93 }
  0x8b   :  { %v97_v5 = vmul.f32 0.03125, %v94_v4  ;;  %v1030_v4 = vld [vmem:[#allocation6 + $0x44] sm:$0xf0] }
  0x8d   :  { %v99_v6 = vadd.f32 1e-08, %v97_v5  ;;  %v1029_v5 = vld [vmem:[#allocation6 + $0x44] sm:$0xf] }
  0x8f   :  { %1127 = vrsqrt.f32 %v99_v6  ;;  %vm107_vm1 = vweird.f32 %v99_v6 }
  0x92   :  { %v96_v7 = vpop.xlane.xlu0 %95 }
  0x93   :  { %v98_v8 = vmul.f32 0.03125, %v96_v7  ;;  %v861_v7 = vld [vmem:[#allocation6 + $0x48] sm:$0xf0] }
  0x95   :  { %v1128_v9 = vpop.eup %1127  ;;  %v100_v10 = vadd.f32 1e-08, %v98_v8  ;;  %v923_v8 = vld [vmem:[#allocation8 + $0x40] sm:$0xf] }
  0x96   :  { %v102_v11 = vmul.f32 %v1128_v9, %v99_v6  ;;  %vm108_vm0 = vweird.f32 %v1128_v9  ;;  %v860_v6 = vor.u32 %v1030_v4, %v859_v3  ;;  %v832_v3 = vor.u32 %v1021_v56, %v829_v58 }
  0x97   :  { %1129 = vrsqrt.f32 %v100_v10  ;;  %vm109_vm2 = vmor %vm107_vm1, %vm108_vm0  ;;  %vm117_vm4 = vweird.f32 %v100_v10  ;;  %v892_v4 = vor.u32 %v1038_v60, %v891_v59 }
  0x98   :  { %v103_v12 = vmul.f32 %v1128_v9, %v102_v11  ;;  %276 = vmatpush.bf16.msra.mxu0 %v860_v6  ;;  %v896_v6 = vor.u32 %v1037_v61, %v893_v62 }
  0x9a   :  { %v104_v13 = vmul.f32 0.5, %v103_v12  ;;  %v1045_v12 = vld [vmem:[#allocation8 + $0x44] sm:$0xf] }
  0x9c   :  { %v105_v14 = vsub.f32 1.5, %v104_v13  ;;  %v925_v13 = vld [vmem:[#allocation8 + $0x48] sm:$0xf0] }
  0x9d   :  { %v1130_v15 = vpop.eup %1129 }
  0x9e   :  { %v112_v16 = vmul.f32 %v1130_v15, %v100_v10  ;;  %v106_v17 = vmul.f32 %v1128_v9, %v105_v14  ;;  %vm118_vm3 = vweird.f32 %v1130_v15  ;;  %v864_v10 = vor.u32 %v1029_v5, %v861_v7  ;;  %v851_v14 = vld [vmem:[#allocation6 + $0x30] sm:$0xf] }
  0x9f   :  { %vm119_vm5 = vmor %vm117_vm4, %vm118_vm3 }
  0xa0   :  { %v113_v19 = vmul.f32 %v1130_v15, %v112_v16  ;;  %v110_v20 = vsel %vm109_vm2, %v1128_v9, %v106_v17  ;;  %v1046_v9 = vld [vmem:[#allocation8 + $0x44] sm:$0xf0]  ;;  %v1028_v16 = vld [vmem:[#allocation6 + $0x34] sm:$0xf0]  ;;  %v1027_v17 = vld [vmem:[#allocation6 + $0x34] sm:$0xf]  ;;  %290 = vmatpush.bf16.msra.mxu1 %v864_v10 }
  0xa1   :  { %v121_v21 = vmul.f32 %v110_v20, %v87_v0  ;;  %v1047_v0 = vld [vmem:[#allocation8 + $0x54] sm:$0xf]  ;;  %v924_v11 = vor.u32 %v1046_v9, %v923_v8 }
  0xa2   :  { %v114_v22 = vmul.f32 0.5, %v113_v19  ;;  %v852_v19 = vor.u32 %v1028_v16, %v851_v14 }
  0xa3   :  { %v1355_v23 = vmul.f32 %v1126_v18, %v121_v21  ;;  %404 = vmatpush.bf16.msra.mxu2 %v924_v11  ;;  %v915_v21 = vld [vmem:[#allocation8 + $0x30] sm:$0xf] }
  0xa4   :  { %v115_v24 = vsub.f32 1.5, %v114_v22  ;;  %v1044_v22 = vld [vmem:[#allocation8 + $0x34] sm:$0xf0]  ;;  %277 = vmatpush.bf16.msra.mxu0 %v852_v19 }
  0xa5   :  { %v128_v25 = vand.u32 2147483647, %v1355_v23 }
  0xa6   :  { %v116_v26 = vmul.f32 %v1130_v15, %v115_v24  ;;  %v1043_v24 = vld [vmem:[#allocation8 + $0x34] sm:$0xf] }
  0xa7   :  { %130 = vmax.xlane.f32.xlu1 %v128_v25  ;;  %v916_v25 = vor.u32 %v1044_v22, %v915_v21 }
  0xa8   :  { %v120_v27 = vsel %vm119_vm5, %v1130_v15, %v116_v26  ;;  %v928_v15 = vor.u32 %v1045_v12, %v925_v13  ;;  %v917_v26 = vld [vmem:[#allocation8 + $0x38] sm:$0xf0] }
  0xa9   :  { %v122_v28 = vmul.f32 %v120_v27, %v88_v2  ;;  %v936_v2 = vor.u32 %v1047_v0, %v933_v1  ;;  %v843_v27 = vld [vmem:[#allocation6 + $0x20] sm:$0xf]  ;;  %405 = vmatpush.bf16.msra.mxu2 %v916_v25  ;;  %v828_v0 = vor.u32 %v1022_v55, %v827_v54 }
  0xab   :  { %v1358_v29 = vmul.f32 %v1126_v18, %v122_v28  ;;  %417 = vmatpush.bf16.msra.mxu3 %v936_v2  ;;  %v853_v18 = vld [vmem:[#allocation6 + $0x38] sm:$0xf0]  ;;  %v1026_v28 = vld [vmem:[#allocation6 + $0x24] sm:$0xf0] }
  0xac   :  { %v856_v20 = vor.u32 %v1027_v17, %v853_v18  ;;  %v844_v35 = vor.u32 %v1026_v28, %v843_v27 }
  0xad   :  { %v129_v30 = vand.u32 2147483647, %v1358_v29  ;;  %406 = vmatpush.bf16.msra.mxu2 %v908_v41 }
  0xae   :  { %291 = vmatpush.bf16.msra.mxu1 %v856_v20  ;;  %278 = vmatpush.bf16.msra.mxu0 %v844_v35 }
  0xaf   :  { %132 = vmax.xlane.f32.xlu1 %v129_v30  ;;  %418 = vmatpush.bf16.msra.mxu3 %v928_v15  ;;  %v920_v30 = vor.u32 %v1043_v24, %v917_v26 }
  0xb1   :  { %407 = vmatpush.bf16.msra.mxu2 %v900_v53 }
  0xb2   :  { %292 = vmatpush.bf16.msra.mxu1 %v848_v40  ;;  %279 = vmatpush.bf16.msra.mxu0 %v836_v49 }
  0xb3   :  { %419 = vmatpush.bf16.msra.mxu3 %v920_v30 }
  0xb5   :  { %408 = vmatpush.bf16.msra.mxu2 %v892_v4 }
  0xb6   :  { %293 = vmatpush.bf16.msra.mxu1 %v840_v52  ;;  %280 = vmatpush.bf16.msra.mxu0 %v828_v0 }
  0xb7   :  { %420 = vmatpush.bf16.msra.mxu3 %v912_v44 }
  0xba   :  { %294 = vmatpush.bf16.msra.mxu1 %v832_v3 }
  0xbb   :  { %421 = vmatpush.bf16.msra.mxu3 %v904_v57 }
  0xbf   :  { %422 = vmatpush.bf16.msra.mxu3 %v896_v6 }
 0x11a   :  { %v131_v34 = vpop.xlane.xlu1 %130 }
 0x11b   :  { %v1361_v39 = vmax.f32 %v131_v34, 1e-05 }
 0x11d   :  { %1131 = vrcp.f32 %v1361_v39  ;;  %v147_v8 = vand.u32 2147483648, %v1361_v39  ;;  %v145_v10 = vand.u32 2147483647, %v1361_v39  ;;  %vm141_vm7 = vweird.f32 %v1361_v39 }
 0x11f   :  { %v148_v13 = vor.u32 1.1754944e-38, %v147_v8  ;;  %vm146_vm9 = vcmp.eq.f32.partialorder %v145_v10, 8.507059e+37 }
 0x122   :  { %v133_v63 = vpop.xlane.xlu1 %132 }
 0x123   :  { %v1132_v1 = vpop.eup %1131  ;;  %v1364_v2 = vmax.f32 %v133_v63, 1e-05 }
 0x124   :  { %v137_v5 = vmul.f32 %v1132_v1, %v1361_v39  ;;  %vm142_vm6 = vweird.f32 %v1132_v1 }
 0x125   :  { %1133 = vrcp.f32 %v1364_v2  ;;  %vm143_vm8 = vmor %vm141_vm7, %vm142_vm6  ;;  %v162_v19 = vand.u32 2147483648, %v1364_v2  ;;  %v160_v21 = vand.u32 2147483647, %v1364_v2  ;;  %vm156_vm11 = vweird.f32 %v1364_v2 }
 0x126   :  { %v138_v7 = vsub.f32 1.0, %v137_v5  ;;  %v1389_v56 = vmul.f32 0.007874016, %v1364_v2 }
 0x127   :  { %v163_v26 = vor.u32 1.1754944e-38, %v162_v19  ;;  %vm161_vm13 = vcmp.eq.f32.partialorder %v160_v21, 8.507059e+37 }
 0x128   :  { %v139_v9 = vmul.f32 %v1132_v1, %v138_v7 }
 0x12a   :  { %v140_v11 = vadd.f32 %v1132_v1, %v139_v9 }
 0x12b   :  { %v1134_v12 = vpop.eup %1133 }
 0x12c   :  { %v144_v14 = vsel %vm143_vm8, %v1132_v1, %v140_v11  ;;  %v152_v15 = vmul.f32 %v1134_v12, %v1364_v2  ;;  %vm157_vm10 = vweird.f32 %v1134_v12 }
 0x12d   :  { %v149_v16 = vsel %vm146_vm9, %v148_v13, %v144_v14  ;;  %vm158_vm12 = vmor %vm156_vm11, %vm157_vm10  ;;  %v90_v14 = vld [vmem:[%s1487_s5] sm:$0x3]  ;;  %s1295_s5 = smov [#allocation11]  }
 0x12e   :  { %v153_v17 = vsub.f32 1.0, %v152_v15  ;;  %v150_v18 = vmul.f32 127.0, %v149_v16  ;;  %v1408_v21 = vperm.slane %v90_v14, 0  ;;  %s808_s20 = sshll.u32 %s1295_s5, 4  ;;  %s809_s20 = int_to_ptr.vmem [resolvable:$true] %s808_s20 }
 0x130   :  { %v154_v20 = vmul.f32 %v1134_v12, %v153_v17  ;;  %v166_v22 = vmul.f32 %v150_v18, %v1355_v23 }
 0x132   :  { %v155_v24 = vadd.f32 %v1134_v12, %v154_v20  ;;  %v1071_v25 = vcvt.f32.s32 %v166_v22  ;;  %v1074_v34 = vand.u32 2147483648, %v166_v22  ;;  %v1069_v35 = vand.u32 2147483647, %v166_v22 }
 0x134   :  { %v159_v27 = vsel %vm158_vm12, %v1134_v12, %v155_v24  ;;  %v1072_v28 = vcvt.s32.f32 %v1071_v25  ;;  %vm1070_vm14 = vcmp.lt.f32.partialorder %v1069_v35, 8388608.0 }
 0x135   :  { %v164_v30 = vsel %vm161_vm13, %v163_v26, %v159_v27  ;;  %v1410_v26 = vperm.slane %v90_v14, 1 }
 0x136   :  { %v165_v31 = vmul.f32 127.0, %v164_v30  ;;  %v1073_v32 = vand.u32 2147483647, %v1072_v28 }
 0x138   :  { %v167_v33 = vmul.f32 %v165_v31, %v1358_v29  ;;  %v1075_v36 = vor.u32 %v1074_v34, %v1073_v32  ;;  %v1378_v29 = vmul.f32 0.007874016, %v1361_v39 }
 0x13a   :  { %v1079_v37 = vcvt.f32.s32 %v167_v33  ;;  %v1077_v23 = vand.u32 2147483647, %v167_v33  ;;  %v1076_v40 = vsel %vm1070_vm14, %v1075_v36, %v166_v22  ;;  %v1082_v42 = vand.u32 2147483648, %v167_v33 }
 0x13b   :  { %v170_v44 = vmax.f32 %v1076_v40, -128.0 }
 0x13c   :  { %v1080_v38 = vcvt.s32.f32 %v1079_v37  ;;  %vm1078_vm15 = vcmp.lt.f32.partialorder %v1077_v23, 8388608.0 }
 0x13d   :  { %v172_v47 = vmin.f32 %v170_v44, 127.0 }
 0x13e   :  { %v1081_v41 = vand.u32 2147483647, %v1080_v38 }
 0x140   :  { %v1083_v43 = vor.u32 %v1082_v42, %v1081_v41 }
 0x142   :  { %v1084_v45 = vsel %vm1078_vm15, %v1083_v43, %v167_v33 }
 0x143   :  { %v171_v46 = vmax.f32 %v1084_v45, -128.0 }
 0x145   :  { %v173_v48 = vmin.f32 %v171_v46, 127.0 }
 0x147   :  { %v174_v49 = vpack.c.bf16 %v173_v48, %v172_v47 }
 0x149   :  { %281 = vmatmul.bf16.vlgmr.msra.gmra.mxu0 %v174_v49  ;;  %295 = vmatmul.bf16.vlgmr.msra.gmra.mxu1 %v174_v49 }
 0x14a   :  { %409 = vmatmul.bf16.vlgmr.msra.gmra.mxu2 %v174_v49  ;;  %423 = vmatmul.bf16.vlgmr.msra.gmra.mxu3 %v174_v49 }
 0x1c6   :  { %v282_v50 = vpop.f32.mrf.mxu0  ;;  %v296_v51 = vpop.f32.mrf.mxu1 }
 0x1c7   :  { %v1381_v52 = vmul.f32 %v282_v50, %v1378_v29  ;;  %v1384_v53 = vmul.f32 %v296_v51, %v1378_v29 }
 0x1c9   :  { %v953_v54 = vmul.f32 -1.442695, %v1381_v52  ;;  %v954_v55 = vmul.f32 -1.442695, %v1384_v53 }
 0x1cb   :  { %1135 = vpow2.f32 %v953_v54 }
 0x1cc   :  { %1137 = vpow2.f32 %v954_v55 }
 0x1cd   :  { %v410_v19 = vpop.f32.mrf.mxu2  ;;  %v424_v30 = vpop.f32.mrf.mxu3 }
 0x1ce   :  { %v284_v57 = vpop.f32.mrf.mxu0  ;;  %v298_v39 = vpop.f32.mrf.mxu1  ;;  %v429_v38 = vmul.f32 %v410_v19, %v1378_v29  ;;  %v430_v41 = vmul.f32 %v424_v30, %v1378_v29 }
 0x1cf   :  { %v1392_v58 = vmul.f32 %v284_v57, %v1389_v56  ;;  %v1395_v59 = vmul.f32 %v298_v39, %v1389_v56 }
 0x1d1   :  { %v1136_v60 = vpop.eup %1135  ;;  %v955_v61 = vmul.f32 -1.442695, %v1392_v58  ;;  %v956_v0 = vmul.f32 -1.442695, %v1395_v59 }
 0x1d2   :  { %v1138_v62 = vpop.eup %1137  ;;  %v445_v63 = vadd.f32 1.0, %v1136_v60 }
 0x1d3   :  { %v446_v1 = vadd.f32 1.0, %v1138_v62  ;;  %1139 = vpow2.f32 %v955_v61 }
 0x1d4   :  { %1141 = vrcp.f32 %v445_v63  ;;  %v458_v11 = vand.u32 2147483647, %v445_v63  ;;  %v460_v12 = vand.u32 2147483648, %v445_v63  ;;  %vm454_vm2 = vweird.f32 %v445_v63 }
 0x1d5   :  { %1143 = vrcp.f32 %v446_v1  ;;  %v475_v16 = vand.u32 2147483648, %v446_v1  ;;  %v473_v18 = vand.u32 2147483647, %v446_v1  ;;  %vm469_vm4 = vweird.f32 %v446_v1  ;;  %v412_v54 = vpop.f32.mrf.mxu2 }
 0x1d6   :  { %1145 = vpow2.f32 %v956_v0  ;;  %v461_v24 = vor.u32 1.1754944e-38, %v460_v12  ;;  %vm459_vm5 = vcmp.eq.f32.partialorder %v458_v11, 8.507059e+37 }
 0x1d7   :  { %v476_v28 = vor.u32 1.1754944e-38, %v475_v16  ;;  %vm474_vm7 = vcmp.eq.f32.partialorder %v473_v18, 8.507059e+37 }
 0x1d9   :  { %v1140_v2 = vpop.eup %1139 }
 0x1da   :  { %v1142_v3 = vpop.eup %1141  ;;  %v1399_v4 = vadd.f32 1.0, %v1140_v2 }
 0x1db   :  { %v1144_v5 = vpop.eup %1143  ;;  %v450_v6 = vmul.f32 %v1142_v3, %v445_v63  ;;  %vm455_vm0 = vweird.f32 %v1142_v3 }
 0x1dc   :  { %v1146_v7 = vpop.eup %1145  ;;  %v465_v8 = vmul.f32 %v1144_v5, %v446_v1  ;;  %1147 = vrcp.f32 %v1399_v4  ;;  %vm470_vm1 = vweird.f32 %v1144_v5  ;;  %vm456_vm3 = vmor %vm454_vm2, %vm455_vm0  ;;  %v490_v34 = vand.u32 2147483648, %v1399_v4 }
 0x1dd   :  { %v451_v9 = vsub.f32 1.0, %v450_v6  ;;  %v1402_v10 = vadd.f32 1.0, %v1146_v7  ;;  %vm471_vm6 = vmor %vm469_vm4, %vm470_vm1  ;;  %vm484_vm8 = vweird.f32 %v1399_v4  ;;  %v488_v45 = vand.u32 2147483647, %v1399_v4 }
 0x1de   :  { %v466_v13 = vsub.f32 1.0, %v465_v8  ;;  %v491_v47 = vor.u32 1.1754944e-38, %v490_v34 }
 0x1df   :  { %v452_v15 = vmul.f32 %v1142_v3, %v451_v9  ;;  %1149 = vrcp.f32 %v1402_v10  ;;  %v503_v49 = vand.u32 2147483647, %v1402_v10  ;;  %v505_v51 = vand.u32 2147483648, %v1402_v10 }
 0x1e0   :  { %v467_v17 = vmul.f32 %v1144_v5, %v466_v13  ;;  %vm489_vm12 = vcmp.eq.f32.partialorder %v488_v45, 8.507059e+37  ;;  %vm499_vm13 = vweird.f32 %v1402_v10 }
 0x1e1   :  { %v453_v20 = vadd.f32 %v1142_v3, %v452_v15  ;;  %v506_v2 = vor.u32 1.1754944e-38, %v505_v51  ;;  %vm504_vm15 = vcmp.eq.f32.partialorder %v503_v49, 8.507059e+37  ;;  %v1064_v51 = vld [vmem:[#allocation9 + $0x58] sm:$0xff] }
 0x1e2   :  { %v1148_v22 = vpop.eup %1147  ;;  %v468_v25 = vadd.f32 %v1144_v5, %v467_v17 }
 0x1e3   :  { %v457_v27 = vsel %vm456_vm3, %v1142_v3, %v453_v20  ;;  %v480_v31 = vmul.f32 %v1148_v22, %v1399_v4  ;;  %vm485_vm9 = vweird.f32 %v1148_v22  ;;  %v431_v3 = vmul.f32 %v412_v54, %v1389_v56  ;;  %v426_v4 = vpop.f32.mrf.mxu3  ;;  %v1060_v20 = vld [vmem:[#allocation9 + $0x38] sm:$0xff]  ;;  %v1063_v54 = vld [vmem:[#allocation9 + $0x50] sm:$0xff] }
 0x1e4   :  { %v462_v32 = vsel %vm459_vm5, %v461_v24, %v457_v27  ;;  %v472_v33 = vsel %vm471_vm6, %v1144_v5, %v468_v25  ;;  %vm486_vm10 = vmor %vm484_vm8, %vm485_vm9  ;;  %770 = vmatpush.bf16.msrb.mxu0 %v1060_v20 }
 0x1e5   :  { %v1150_v35 = vpop.eup %1149  ;;  %v509_v36 = vmul.f32 %v462_v32, %v1381_v52  ;;  %v477_v37 = vsel %vm474_vm7, %v476_v28, %v472_v33  ;;  %v481_v23 = vsub.f32 1.0, %v480_v31  ;;  %v1059_v31 = vld [vmem:[#allocation9 + $0x30] sm:$0xff] }
 0x1e6   :  { %v510_v40 = vmul.f32 %v477_v37, %v1384_v53  ;;  %v495_v42 = vmul.f32 %v1150_v35, %v1402_v10  ;;  %vm500_vm11 = vweird.f32 %v1150_v35  ;;  %v432_v10 = vmul.f32 %v426_v4, %v1389_v56  ;;  %v1067_v32 = vld [vmem:[#allocation9 + $0x70] sm:$0xff]  ;;  %v1053_v4 = vld [vmem:[#allocation9] sm:$0xff] }
 0x1e7   :  { %v1420_v43 = vmul.f32 %v509_v36, %v429_v38  ;;  %v482_v44 = vmul.f32 %v1148_v22, %v481_v23  ;;  %vm501_vm14 = vmor %vm499_vm13, %vm500_vm11  ;;  %v1066_v36 = vld [vmem:[#allocation9 + $0x68] sm:$0xff] }
 0x1e8   :  { %v1423_v46 = vmul.f32 %v510_v40, %v430_v41  ;;  %v496_v48 = vsub.f32 1.0, %v495_v42  ;;  %771 = vmatpush.bf16.msrb.mxu0 %v1059_v31  ;;  %v1057_v42 = vld [vmem:[#allocation9 + $0x20] sm:$0xff] }
 0x1e9   :  { %v483_v50 = vadd.f32 %v1148_v22, %v482_v44  ;;  %v521_v29 = vmul.f32 %v1420_v43, %v1420_v43  ;;  %v538_v52 = vmul.f32 %v1408_v21, %v1420_v43  ;;  %v1065_v44 = vld [vmem:[#allocation9 + $0x60] sm:$0xff] }
 0x1ea   :  { %v497_v53 = vmul.f32 %v1150_v35, %v496_v48  ;;  %v522_v55 = vmul.f32 %v1423_v46, %v1423_v46  ;;  %v539_v57 = vmul.f32 %v1410_v26, %v1423_v46 }
 0x1eb   :  { %v487_v39 = vsel %vm486_vm10, %v1148_v22, %v483_v50  ;;  %v542_v60 = vand.u32 2147483647, %v538_v52  ;;  %v1068_v22 = vld [vmem:[#allocation9 + $0x78] sm:$0xff] }
 0x1ec   :  { %v492_v61 = vsel %vm489_vm12, %v491_v47, %v487_v39  ;;  %v498_v62 = vadd.f32 %v1150_v35, %v497_v53  ;;  %v525_v63 = vadd.f32 %v522_v55, %v521_v29  ;;  %v543_v0 = vand.u32 2147483647, %v539_v57  ;;  %784 = vmatpush.bf16.msrb.mxu1 %v1068_v22  ;;  %v1056_v50 = vld [vmem:[#allocation9 + $0x18] sm:$0xff]  ;;  %v1055_v53 = vld [vmem:[#allocation9 + $0x10] sm:$0xff] }
 0x1ed   :  { %v511_v1 = vmul.f32 %v492_v61, %v1392_v58  ;;  %v1054_v61 = vld [vmem:[#allocation9 + $0x8] sm:$0xff] }
 0x1ee   :  { %v502_v5 = vsel %vm501_vm14, %v1150_v35, %v498_v62  ;;  %526 = vadd.xlane.f32.xlu2 %v525_v63  ;;  %v546_v6 = vmax.f32 %v542_v60, %v543_v0  ;;  %v1058_v35 = vld [vmem:[#allocation9 + $0x28] sm:$0xff] }
 0x1ef   :  { %v507_v7 = vsel %vm504_vm15, %v506_v2, %v502_v5  ;;  %v1438_v8 = vmul.f32 %v511_v1, %v431_v3  ;;  %772 = vmatpush.bf16.msrb.mxu0 %v1058_v35  ;;  %v1062_v62 = vld [vmem:[#allocation9 + $0x48] sm:$0xff]  ;;  %v1061_v5 = vld [vmem:[#allocation9 + $0x40] sm:$0xff] }
 0x1f0   :  { %v512_v9 = vmul.f32 %v507_v7, %v1395_v59  ;;  %547 = vmax.xlane.f32.xlu0 %v546_v6  ;;  %785 = vmatpush.bf16.msrb.mxu1 %v1067_v32 }
 0x1f1   :  { %v540_v58 = vmul.f32 %v1408_v21, %v1438_v8  ;;  %v523_v12 = vmul.f32 %v1438_v8, %v1438_v8 }
 0x1f2   :  { %v1444_v11 = vmul.f32 %v512_v9, %v432_v10 }
 0x1f3   :  { %v544_v15 = vand.u32 2147483647, %v540_v58  ;;  %773 = vmatpush.bf16.msrb.mxu0 %v1057_v42 }
 0x1f4   :  { %v524_v13 = vmul.f32 %v1444_v11, %v1444_v11  ;;  %v541_v14 = vmul.f32 %v1410_v26, %v1444_v11  ;;  %786 = vmatpush.bf16.msrb.mxu1 %v1066_v36 }
 0x1f6   :  { %v528_v16 = vadd.f32 %v524_v13, %v523_v12  ;;  %v545_v59 = vand.u32 2147483647, %v541_v14 }
 0x1f7   :  { %774 = vmatpush.bf16.msrb.mxu0 %v1056_v50 }
 0x1f8   :  { %529 = vadd.xlane.f32.xlu2 %v528_v16  ;;  %v549_v56 = vmax.f32 %v544_v15, %v545_v59  ;;  %787 = vmatpush.bf16.msrb.mxu1 %v1065_v44 }
 0x1fa   :  { %550 = vmax.xlane.f32.xlu1 %v549_v56 }
 0x1fb   :  { %775 = vmatpush.bf16.msrb.mxu0 %v1055_v53 }
 0x1fc   :  { %788 = vmatpush.bf16.msrb.mxu1 %v1064_v51 }
 0x1ff   :  { %776 = vmatpush.bf16.msrb.mxu0 %v1054_v61 }
 0x200   :  { %789 = vmatpush.bf16.msrb.mxu1 %v1063_v54 }
 0x203   :  { %777 = vmatpush.bf16.msrb.mxu0 %v1053_v4 }
 0x204   :  { %790 = vmatpush.bf16.msrb.mxu1 %v1062_v62 }
 0x208   :  { %791 = vmatpush.bf16.msrb.mxu1 %v1061_v5 }
 0x261   :  { %v527_v17 = vpop.xlane.xlu2 %526 }
 0x262   :  { %v554_v18 = vmul.f32 0.00390625, %v527_v17 }
 0x263   :  { %v548_v38 = vpop.xlane.xlu0 %547 }
 0x264   :  { %v556_v19 = vadd.f32 1e-08, %v554_v18  ;;  %v552_v41 = vmax.f32 %v548_v38, 0.0 }
 0x266   :  { %1151 = vrsqrt.f32 %v556_v19  ;;  %vm564_vm1 = vweird.f32 %v556_v19 }
 0x26b   :  { %v530_v24 = vpop.xlane.xlu2 %529 }
 0x26c   :  { %v1152_v25 = vpop.eup %1151  ;;  %v555_v27 = vmul.f32 0.00390625, %v530_v24 }
 0x26d   :  { %v559_v28 = vmul.f32 %v1152_v25, %v556_v19  ;;  %vm565_vm0 = vweird.f32 %v1152_v25  ;;  %v551_v57 = vpop.xlane.xlu1 %550 }
 0x26e   :  { %v557_v30 = vadd.f32 1e-08, %v555_v27  ;;  %vm566_vm2 = vmor %vm564_vm1, %vm565_vm0  ;;  %v553_v60 = vmax.f32 %v551_v57, 0.0 }
 0x26f   :  { %v560_v33 = vmul.f32 %v1152_v25, %v559_v28 }
 0x270   :  { %1153 = vrsqrt.f32 %v557_v30  ;;  %vm574_vm4 = vweird.f32 %v557_v30 }
 0x271   :  { %v561_v34 = vmul.f32 0.5, %v560_v33 }
 0x273   :  { %v562_v37 = vsub.f32 1.5, %v561_v34 }
 0x275   :  { %v563_v23 = vmul.f32 %v1152_v25, %v562_v37 }
 0x276   :  { %v1154_v40 = vpop.eup %1153 }
 0x277   :  { %v567_v45 = vsel %vm566_vm2, %v1152_v25, %v563_v23  ;;  %v569_v47 = vmul.f32 %v1154_v40, %v557_v30  ;;  %vm575_vm3 = vweird.f32 %v1154_v40 }
 0x278   :  { %v578_v48 = vmul.f32 %v567_v45, %v552_v41  ;;  %vm576_vm5 = vmor %vm574_vm4, %vm575_vm3  ;;  %v616_v12 = vmul.f32 %v567_v45, %v1420_v43  ;;  %v617_v13 = vmul.f32 %v567_v45, %v1423_v46 }
 0x279   :  { %v570_v49 = vmul.f32 %v1154_v40, %v569_v47 }
 0x27a   :  { %v1452_v29 = vmax.f32 %v578_v48, 1e-05  ;;  %v620_v17 = vmul.f32 %v616_v12, %v1408_v21  ;;  %v621_v18 = vmul.f32 %v617_v13, %v1410_v26 }
 0x27b   :  { %v571_v52 = vmul.f32 0.5, %v570_v49 }
 0x27c   :  { %1155 = vrcp.f32 %v1452_v29  ;;  %v593_v7 = vand.u32 2147483648, %v1452_v29  ;;  %v591_v10 = vand.u32 2147483647, %v1452_v29  ;;  %vm587_vm7 = vweird.f32 %v1452_v29 }
 0x27d   :  { %v572_v55 = vsub.f32 1.5, %v571_v52 }
 0x27e   :  { %v594_v14 = vor.u32 1.1754944e-38, %v593_v7  ;;  %vm592_vm9 = vcmp.eq.f32.partialorder %v591_v10, 8.507059e+37 }
 0x27f   :  { %v573_v39 = vmul.f32 %v1154_v40, %v572_v55 }
 0x281   :  { %v577_v63 = vsel %vm576_vm5, %v1154_v40, %v573_v39 }
 0x282   :  { %v1156_v0 = vpop.eup %1155  ;;  %v579_v1 = vmul.f32 %v577_v63, %v553_v60  ;;  %v618_v28 = vmul.f32 %v577_v63, %v1438_v8  ;;  %v619_v32 = vmul.f32 %v577_v63, %v1444_v11 }
 0x283   :  { %v583_v2 = vmul.f32 %v1156_v0, %v1452_v29  ;;  %vm588_vm6 = vweird.f32 %v1156_v0 }
 0x284   :  { %v1456_v3 = vmax.f32 %v579_v1, 1e-05  ;;  %vm589_vm8 = vmor %vm587_vm7, %vm588_vm6  ;;  %v622_v23 = vmul.f32 %v618_v28, %v1408_v21  ;;  %v623_v40 = vmul.f32 %v619_v32, %v1410_v26 }
 0x285   :  { %v584_v6 = vsub.f32 1.0, %v583_v2 }
 0x286   :  { %1157 = vrcp.f32 %v1456_v3  ;;  %v608_v43 = vand.u32 2147483648, %v1456_v3  ;;  %v606_v46 = vand.u32 2147483647, %v1456_v3  ;;  %vm602_vm11 = vweird.f32 %v1456_v3 }
 0x287   :  { %v585_v9 = vmul.f32 %v1156_v0, %v584_v6 }
 0x288   :  { %v609_v34 = vor.u32 1.1754944e-38, %v608_v43  ;;  %vm607_vm13 = vcmp.eq.f32.partialorder %v606_v46, 8.507059e+37 }
 0x289   :  { %v586_v58 = vadd.f32 %v1156_v0, %v585_v9 }
 0x28b   :  { %v590_v15 = vsel %vm589_vm8, %v1156_v0, %v586_v58 }
 0x28c   :  { %v1158_v16 = vpop.eup %1157  ;;  %v595_v59 = vsel %vm592_vm9, %v594_v14, %v590_v15 }
 0x28d   :  { %v596_v56 = vmul.f32 127.0, %v595_v59  ;;  %v598_v19 = vmul.f32 %v1158_v16, %v1456_v3  ;;  %vm603_vm10 = vweird.f32 %v1158_v16 }
 0x28e   :  { %vm604_vm12 = vmor %vm602_vm11, %vm603_vm10 }
 0x28f   :  { %v624_v20 = vmul.f32 %v620_v17, %v596_v56  ;;  %v625_v22 = vmul.f32 %v621_v18, %v596_v56  ;;  %v599_v24 = vsub.f32 1.0, %v598_v19  ;;  %v798_v56 = vmul.f32 0.007874016, %v1452_v29 }
 0x291   :  { %v600_v25 = vmul.f32 %v1158_v16, %v599_v24  ;;  %v1087_v27 = vcvt.f32.s32 %v624_v20  ;;  %v1095_v30 = vcvt.f32.s32 %v625_v22  ;;  %v1090_v45 = vand.u32 2147483648, %v624_v20 }
 0x292   :  { %v1085_v47 = vand.u32 2147483647, %v624_v20  ;;  %v1093_v48 = vand.u32 2147483647, %v625_v22  ;;  %v1098_v11 = vand.u32 2147483648, %v625_v22 }
 0x293   :  { %v601_v31 = vadd.f32 %v1158_v16, %v600_v25  ;;  %v1088_v33 = vcvt.s32.f32 %v1087_v27  ;;  %v1096_v35 = vcvt.s32.f32 %v1095_v30 }
 0x294   :  { %vm1086_vm14 = vcmp.lt.f32.partialorder %v1085_v47, 8388608.0  ;;  %vm1094_vm15 = vcmp.lt.f32.partialorder %v1093_v48, 8388608.0 }
 0x295   :  { %v605_v36 = vsel %vm604_vm12, %v1158_v16, %v601_v31  ;;  %v1089_v41 = vand.u32 2147483647, %v1088_v33  ;;  %v1097_v8 = vand.u32 2147483647, %v1096_v35 }
 0x296   :  { %v610_v37 = vsel %vm607_vm13, %v609_v34, %v605_v36 }
 0x297   :  { %v611_v38 = vmul.f32 127.0, %v610_v37  ;;  %v1091_v49 = vor.u32 %v1090_v45, %v1089_v41  ;;  %v1099_v51 = vor.u32 %v1098_v11, %v1097_v8 }
 0x299   :  { %v626_v42 = vmul.f32 %v622_v23, %v611_v38  ;;  %v627_v44 = vmul.f32 %v623_v40, %v611_v38  ;;  %v1092_v21 = vsel %vm1086_vm14, %v1091_v49, %v624_v20  ;;  %v1100_v60 = vsel %vm1094_vm15, %v1099_v51, %v625_v22 }
 0x29a   :  { %v632_v0 = vmax.f32 %v1092_v21, -128.0  ;;  %v633_v4 = vmax.f32 %v1100_v60, -128.0  ;;  %v799_v22 = vmul.f32 0.007874016, %v1456_v3 }
 0x29b   :  { %v1103_v50 = vcvt.f32.s32 %v626_v42  ;;  %v1111_v52 = vcvt.f32.s32 %v627_v44  ;;  %v1101_v54 = vand.u32 2147483647, %v626_v42  ;;  %v1106_v26 = vand.u32 2147483648, %v626_v42 }
 0x29c   :  { %v1109_v39 = vand.u32 2147483647, %v627_v44  ;;  %v1114_v62 = vand.u32 2147483648, %v627_v44  ;;  %v636_v9 = vmin.f32 %v632_v0, 127.0  ;;  %v637_v58 = vmin.f32 %v633_v4, 127.0 }
 0x29d   :  { %v1104_v53 = vcvt.s32.f32 %v1103_v50  ;;  %v1112_v55 = vcvt.s32.f32 %v1111_v52  ;;  %vm1102_vm0 = vcmp.lt.f32.partialorder %v1101_v54, 8388608.0 }
 0x29e   :  { %vm1110_vm1 = vcmp.lt.f32.partialorder %v1109_v39, 8388608.0 }
 0x29f   :  { %v1105_v57 = vand.u32 2147483647, %v1104_v53  ;;  %v1113_v61 = vand.u32 2147483647, %v1112_v55 }
 0x2a1   :  { %v1107_v63 = vor.u32 %v1106_v26, %v1105_v57  ;;  %v1115_v1 = vor.u32 %v1114_v62, %v1113_v61 }
 0x2a3   :  { %v1108_v2 = vsel %vm1102_vm0, %v1107_v63, %v626_v42  ;;  %v1116_v6 = vsel %vm1110_vm1, %v1115_v1, %v627_v44 }
 0x2a4   :  { %v634_v5 = vmax.f32 %v1108_v2, -128.0  ;;  %v635_v7 = vmax.f32 %v1116_v6, -128.0 }
 0x2a6   :  { %v638_v10 = vmin.f32 %v634_v5, 127.0  ;;  %v639_v12 = vmin.f32 %v635_v7, 127.0 }
 0x2a8   :  { %v640_v13 = vpack.c.bf16 %v638_v10, %v636_v9  ;;  %v641_v14 = vpack.c.bf16 %v639_v12, %v637_v58 }
 0x2aa   :  { %778 = vmatmul.bf16.vlgmr.msrb.gmra.mxu0 %v640_v13  ;;  %792 = vmatmul.bf16.vlgmr.msrb.gmra.mxu1 %v641_v14 }
 0x327   :  { %v779_v15 = vpop.f32.mrf.mxu0  ;;  %v793_v16 = vpop.f32.mrf.mxu1 }
 0x328   :  { %v794_v59 = vadd.f32 %v793_v16, %v779_v15 }
 0x32a   :  { %v800_v17 = vmul.f32 %v798_v56, %v794_v59 }
 0x32c   :  { %802 = vst [vmem:[#allocation11] sm:$0xff] %v800_v17 }
 0x32f   :  { %v781_v18 = vpop.f32.mrf.mxu0  ;;  %v795_v19 = vpop.f32.mrf.mxu1 }
 0x330   :  { %v796_v20 = vadd.f32 %v795_v19, %v781_v18 }
 0x332   :  { %v801_v24 = vmul.f32 %v799_v22, %v796_v20 }
 0x334   :  { %803 = vst [vmem:[#allocation11 + $0x8] sm:$0xff] %v801_v24 }
 0x335   :  { %816 = dma.vmem_to_hbm [thread:$0]  %s809_s20, 256, %s811_s23, [#allocation5], %s1288_s29, %s1288_s29, %s1289_s30  }
 0x336   :  { %1285 = dma.done.wait [#allocation5], 256  }
 0x337   :  { %1286 = vsyncadd [#allocation5], 4294967040 }
 0x338   :  { %821 = vsyncpa [#allocation4], 1 }
 0x339   :  { %822 = vsyncpa [#allocation7], 1 }
 0x33a   :  { %823 = vsyncpa [#allocation10], 1 }
 0x33b   :  { %824 = vsyncpa [#allocation5], 1 }

</bundles_post_ra>
